<compile_context>
chip_gen: v5e
topology: v5e:2x2
jax: 0.10.0
libtpu: 0.0.40
codegen_flags: <defaults>
</compile_context>

<pallas_src>
import functools

import jax
import jax.numpy as jnp
from jax.experimental import pallas as pl
from jax.experimental.pallas import tpu as pltpu


# ----------------------------------------------------------------------------- in-kernel helpers

def _erf_approx(z):
    # Abramowitz & Stegun 7.1.26, max abs error 1.5e-7.
    az = jnp.abs(z)
    t = 1.0 / (1.0 + 0.3275911 * az)
    poly = t * (0.254829592
                + t * (-0.284496736
                       + t * (1.421413741
                              + t * (-1.453152027
                                     + t * 1.061405429))))
    y = 1.0 - poly * jnp.exp(-az * az)
    return jnp.where(z >= 0.0, y, -y)


def _gelu_exact(x):
    # TODO(synk): exact erf-GELU approximated with Abramowitz-Stegun 7.1.26 (<=1.5e-7 abs err)
    # inside the kernel to avoid relying on lax.erf lowering in Mosaic.
    return 0.5 * x * (1.0 + _erf_approx(x * 0.7071067811865476))


# ----------------------------------------------------------------------------- fused kernel

def _transformer_kernel(*refs, depth, heads, dim_head, B, N, eps):
    """refs = (x_ref, <12 weight refs per layer>..., final_g, final_b, out_ref)."""
    x_ref = refs[0]
    o_ref = refs[-1]
    w = refs[1:-1]

    f32 = jnp.float32
    inner = heads * dim_head
    scale = float(dim_head) ** -0.5

    def layernorm(x, g_ref, b_ref):
        mu = jnp.mean(x, axis=-1, keepdims=True)
        xc = x - mu
        var = jnp.mean(xc * xc, axis=-1, keepdims=True)  # biased variance == nn.LayerNorm
        y = xc * jax.lax.rsqrt(var + eps)
        return y * g_ref[...].astype(f32) + b_ref[...].astype(f32)

    x = x_ref[...].astype(f32)                                   # (B*N, D)

    for l in range(depth):
        (g1, bn1, wq, wkv, wo, bo,
         g2, bn2, w1, b1, w2, b2) = w[12 * l: 12 * l + 12]

        # ---------------- attention block: x = attn(LN(x)) + x ----------------
        xn = layernorm(x, g1, bn1)                               # (B*N, D)
        q = jnp.dot(xn, wq[...].astype(f32), preferred_element_type=f32)    # (B*N, inner)
        kv = jnp.dot(xn, wkv[...].astype(f32), preferred_element_type=f32)  # (B*N, 2*inner)
        k = kv[:, :inner]
        v = kv[:, inner:]

        batch_outs = []
        for b in range(B):
            rows = slice(b * N, (b + 1) * N)
            head_outs = []
            for h in range(heads):
                cols = slice(h * dim_head, (h + 1) * dim_head)
                qh = q[rows, cols]                               # (N, d)
                kh = k[rows, cols]                               # (N, d)
                vh = v[rows, cols]                               # (N, d)
                s = jax.lax.dot_general(qh, kh, (((1,), (1,)), ((), ())),
                                        preferred_element_type=f32) * scale   # (N, N)
                s = s - jnp.max(s, axis=-1, keepdims=True)
                e = jnp.exp(s)
                p = e * pl.reciprocal(jnp.sum(e, axis=-1, keepdims=True), approx=True)
                head_outs.append(jnp.dot(p, vh, preferred_element_type=f32))  # (N, d)
            batch_outs.append(jnp.concatenate(head_outs, axis=-1))            # (N, inner)
        attn = jnp.concatenate(batch_outs, axis=0)               # (B*N, inner)

        attn = (jnp.dot(attn, wo[...].astype(f32), preferred_element_type=f32)
                + bo[...].astype(f32))                           # (B*N, D)
        x = x + attn

        # ---------------- feed-forward block: x = ff(LN(x)) + x ----------------
        xn = layernorm(x, g2, bn2)
        hdn = (jnp.dot(xn, w1[...].astype(f32), preferred_element_type=f32)
               + b1[...].astype(f32))                            # (B*N, mlp)
        hdn = _gelu_exact(hdn)
        y = (jnp.dot(hdn, w2[...].astype(f32), preferred_element_type=f32)
             + b2[...].astype(f32))                              # (B*N, D)
        x = x + y

    # final LayerNorm
    x = layernorm(x, w[-2], w[-1])
    o_ref[...] = x.astype(o_ref.dtype)


# ----------------------------------------------------------------------------- wrapper

_VMEM = pl.BlockSpec(memory_space=pltpu.MemorySpace.VMEM)


def transformer_forward(x, params):
    """x: (B, N, D).  Fused Transformer forward: one pallas_call total."""
    B, N, D = x.shape
    heads = params['heads']
    dim_head = params['dim_head']
    depth = len(params['layers'])

    flat = []
    for layer in params['layers']:
        flat += [
            layer['attn_norm']['g'].reshape(1, -1), layer['attn_norm']['b'].reshape(1, -1),
            layer['attn']['to_q']['w'], layer['attn']['to_kv']['w'],
            layer['attn']['to_out']['w'], layer['attn']['to_out']['b'].reshape(1, -1),
            layer['ff_norm']['g'].reshape(1, -1), layer['ff_norm']['b'].reshape(1, -1),
            layer['ff1']['w'], layer['ff1']['b'].reshape(1, -1),
            layer['ff2']['w'], layer['ff2']['b'].reshape(1, -1),
        ]
    flat += [params['norm']['g'].reshape(1, -1), params['norm']['b'].reshape(1, -1)]

    x2 = x.reshape(B * N, D)
    out = pl.pallas_call(
        functools.partial(_transformer_kernel, depth=depth, heads=heads,
                          dim_head=dim_head, B=B, N=N, eps=1e-5),
        out_shape=jax.ShapeDtypeStruct((B * N, D), x.dtype),
        in_specs=[_VMEM] * (1 + len(flat)),
        out_specs=_VMEM,
    )(x2, *flat)
    return out.reshape(B, N, D)


# ----------------------------------------------------------------------------- params init

def init_linear(key, din, dout, bias=True):
    w = jax.random.normal(key, (din, dout), jnp.float32) * 0.02
    b = jnp.zeros((dout,), jnp.float32) if bias else None
    return {'w': w, 'b': b}


def init_ln(dim):
    return {'g': jnp.ones((dim,), jnp.float32), 'b': jnp.zeros((dim,), jnp.float32)}


def init_attention(key, dim, heads, dim_head):
    inner = heads * dim_head
    k1, k2, k3 = jax.random.split(key, 3)
    return {'to_q': init_linear(k1, dim, inner, bias=False),
            'to_kv': init_linear(k2, dim, 2 * inner, bias=False),
            'to_out': init_linear(k3, inner, dim, bias=True)}


def init_transformer(key, dim, depth, heads, dim_head, mlp_dim):
    layers = []
    for _ in range(depth):
        key, ka, kf1, kf2 = jax.random.split(key, 4)
        layers.append({'attn_norm': init_ln(dim),
                       'attn': init_attention(ka, dim, heads, dim_head),
                       'ff_norm': init_ln(dim),
                       'ff1': init_linear(kf1, dim, mlp_dim),
                       'ff2': init_linear(kf2, mlp_dim, dim)})
    return {'layers': layers, 'norm': init_ln(dim), 'heads': heads, 'dim_head': dim_head}


# ----------------------------------------------------------------------------- plain-JAX reference

def _reference_forward(x, params):
    heads, dim_head = params['heads'], params['dim_head']
    inner = heads * dim_head

    def ln(t, p):
        mu = jnp.mean(t, -1, keepdims=True)
        var = jnp.mean((t - mu) ** 2, -1, keepdims=True)
        return (t - mu) / jnp.sqrt(var + 1e-5) * p['g'] + p['b']

    B, N, _ = x.shape
    for layer in params['layers']:
        xn = ln(x, layer['attn_norm'])
        q = xn @ layer['attn']['to_q']['w']
        kv = xn @ layer['attn']['to_kv']['w']
        k, v = kv[..., :inner], kv[..., inner:]

        def split(t):
            return t.reshape(B, N, heads, dim_head).transpose(0, 2, 1, 3)

        qh, kh, vh = split(q), split(k), split(v)
        s = jnp.einsum('bhid,bhjd->bhij', qh, kh) * dim_head ** -0.5
        p = jax.nn.softmax(s, axis=-1)
        o = jnp.einsum('bhij,bhjd->bhid', p, vh)
        o = o.transpose(0, 2, 1, 3).reshape(B, N, inner)
        x = o @ layer['attn']['to_out']['w'] + layer['attn']['to_out']['b'] + x

        xn = ln(x, layer['ff_norm'])
        h = xn @ layer['ff1']['w'] + layer['ff1']['b']
        h = jax.nn.gelu(h, approximate=False)
        x = h @ layer['ff2']['w'] + layer['ff2']['b'] + x
    return ln(x, params['norm'])


# ----------------------------------------------------------------------------- main

if __name__ == "__main__":
    key = jax.random.PRNGKey(0)
    kx, kp = jax.random.split(key, 2)

    # Small shapes consistent with the module: Transformer(dim, depth, heads, dim_head, mlp_dim)
    B, N = 2, 8
    dim, depth, heads, dim_head, mlp_dim = 32, 2, 2, 16, 64

    params = init_transformer(kp, dim, depth, heads, dim_head, mlp_dim)
    x = jax.random.normal(kx, (B, N, dim), jnp.float32)

    out = transformer_forward(x, params)
    out = jax.block_until_ready(out)

    ref = jax.block_until_ready(_reference_forward(x, params))

    assert out.shape == x.shape and out.dtype == x.dtype
    assert bool(jnp.all(jnp.isfinite(out)))
    assert bool(jnp.allclose(out, ref, rtol=2e-3, atol=2e-3)), \
        f"max abs diff {float(jnp.max(jnp.abs(out - ref)))}"
    print("KERNEL_OK")
</pallas_src>

<mosaic_0001>
module attributes {stable_mosaic.version = 11 : i64} {
  func.func @_transformer_kernel(%arg0: memref<16x32xf32, #tpu.memory_space<vmem>>, %arg1: memref<1x32xf32, #tpu.memory_space<vmem>>, %arg2: memref<1x32xf32, #tpu.memory_space<vmem>>, %arg3: memref<32x32xf32, #tpu.memory_space<vmem>>, %arg4: memref<32x64xf32, #tpu.memory_space<vmem>>, %arg5: memref<32x32xf32, #tpu.memory_space<vmem>>, %arg6: memref<1x32xf32, #tpu.memory_space<vmem>>, %arg7: memref<1x32xf32, #tpu.memory_space<vmem>>, %arg8: memref<1x32xf32, #tpu.memory_space<vmem>>, %arg9: memref<32x64xf32, #tpu.memory_space<vmem>>, %arg10: memref<1x64xf32, #tpu.memory_space<vmem>>, %arg11: memref<64x32xf32, #tpu.memory_space<vmem>>, %arg12: memref<1x32xf32, #tpu.memory_space<vmem>>, %arg13: memref<1x32xf32, #tpu.memory_space<vmem>>, %arg14: memref<1x32xf32, #tpu.memory_space<vmem>>, %arg15: memref<32x32xf32, #tpu.memory_space<vmem>>, %arg16: memref<32x64xf32, #tpu.memory_space<vmem>>, %arg17: memref<32x32xf32, #tpu.memory_space<vmem>>, %arg18: memref<1x32xf32, #tpu.memory_space<vmem>>, %arg19: memref<1x32xf32, #tpu.memory_space<vmem>>, %arg20: memref<1x32xf32, #tpu.memory_space<vmem>>, %arg21: memref<32x64xf32, #tpu.memory_space<vmem>>, %arg22: memref<1x64xf32, #tpu.memory_space<vmem>>, %arg23: memref<64x32xf32, #tpu.memory_space<vmem>>, %arg24: memref<1x32xf32, #tpu.memory_space<vmem>>, %arg25: memref<1x32xf32, #tpu.memory_space<vmem>>, %arg26: memref<1x32xf32, #tpu.memory_space<vmem>>, %arg27: memref<16x32xf32, #tpu.memory_space<vmem>>) attributes {dimension_semantics = [], scalar_prefetch = 0 : i64, scratch_operands = 0 : i64, tpu.core_type = #tpu.core_type<tc>} {
    %c0 = arith.constant 0 : index
    %c0_0 = arith.constant 0 : index
    %0 = vector.load %arg0[%c0, %c0_0] : memref<16x32xf32, #tpu.memory_space<vmem>>, vector<16x32xf32>
    %cst = arith.constant dense<0.000000e+00> : vector<16xf32>
    %1 = vector.multi_reduction <add>, %0, %cst [1] : vector<16x32xf32> to vector<16xf32>
    %2 = vector.shape_cast %1 : vector<16xf32> to vector<16x1xf32>
    %cst_1 = arith.constant 3.200000e+01 : f32
    %3 = vector.broadcast %cst_1 : f32 to vector<16x1xf32>
    %4 = arith.divf %2, %3 : vector<16x1xf32>
    %5 = vector.broadcast %4 : vector<16x1xf32> to vector<16x32xf32>
    %6 = arith.subf %0, %5 : vector<16x32xf32>
    %7 = arith.mulf %6, %6 : vector<16x32xf32>
    %cst_2 = arith.constant dense<0.000000e+00> : vector<16xf32>
    %8 = vector.multi_reduction <add>, %7, %cst_2 [1] : vector<16x32xf32> to vector<16xf32>
    %9 = vector.shape_cast %8 : vector<16xf32> to vector<16x1xf32>
    %cst_3 = arith.constant 3.200000e+01 : f32
    %10 = vector.broadcast %cst_3 : f32 to vector<16x1xf32>
    %11 = arith.divf %9, %10 : vector<16x1xf32>
    %cst_4 = arith.constant 9.99999974E-6 : f32
    %12 = vector.broadcast %cst_4 : f32 to vector<16x1xf32>
    %13 = arith.addf %11, %12 : vector<16x1xf32>
    %14 = math.rsqrt %13 : vector<16x1xf32>
    %15 = vector.broadcast %14 : vector<16x1xf32> to vector<16x32xf32>
    %16 = arith.mulf %6, %15 : vector<16x32xf32>
    %c0_5 = arith.constant 0 : index
    %c0_6 = arith.constant 0 : index
    %17 = vector.load %arg1[%c0_5, %c0_6] : memref<1x32xf32, #tpu.memory_space<vmem>>, vector<1x32xf32>
    %18 = vector.broadcast %17 : vector<1x32xf32> to vector<16x32xf32>
    %19 = arith.mulf %16, %18 : vector<16x32xf32>
    %c0_7 = arith.constant 0 : index
    %c0_8 = arith.constant 0 : index
    %20 = vector.load %arg2[%c0_7, %c0_8] : memref<1x32xf32, #tpu.memory_space<vmem>>, vector<1x32xf32>
    %21 = vector.broadcast %20 : vector<1x32xf32> to vector<16x32xf32>
    %22 = arith.addf %19, %21 : vector<16x32xf32>
    %c0_9 = arith.constant 0 : index
    %c0_10 = arith.constant 0 : index
    %23 = vector.load %arg3[%c0_9, %c0_10] : memref<32x32xf32, #tpu.memory_space<vmem>>, vector<32x32xf32>
    %cst_11 = arith.constant dense<0.000000e+00> : vector<16x32xf32>
    %24 = tpu.matmul %22, %23, %cst_11 {dimension_numbers = #tpu.dot_dimension_numbers<[1], [0], [0], [1], [0, 0, 1, 1], [], []>} : vector<16x32xf32>, vector<32x32xf32>, vector<16x32xf32> -> vector<16x32xf32>
    %c0_12 = arith.constant 0 : index
    %c0_13 = arith.constant 0 : index
    %25 = vector.load %arg4[%c0_12, %c0_13] : memref<32x64xf32, #tpu.memory_space<vmem>>, vector<32x64xf32>
    %cst_14 = arith.constant dense<0.000000e+00> : vector<16x64xf32>
    %26 = tpu.matmul %22, %25, %cst_14 {dimension_numbers = #tpu.dot_dimension_numbers<[1], [0], [0], [1], [0, 0, 1, 1], [], []>} : vector<16x32xf32>, vector<32x64xf32>, vector<16x64xf32> -> vector<16x64xf32>
    %27 = vector.extract_strided_slice %26 {offsets = [0, 0], sizes = [16, 32], strides = [1, 1]} : vector<16x64xf32> to vector<16x32xf32>
    %28 = vector.extract_strided_slice %26 {offsets = [0, 32], sizes = [16, 32], strides = [1, 1]} : vector<16x64xf32> to vector<16x32xf32>
    %29 = vector.extract_strided_slice %24 {offsets = [0, 0], sizes = [8, 16], strides = [1, 1]} : vector<16x32xf32> to vector<8x16xf32>
    %30 = vector.extract_strided_slice %27 {offsets = [0, 0], sizes = [8, 16], strides = [1, 1]} : vector<16x32xf32> to vector<8x16xf32>
    %31 = vector.extract_strided_slice %28 {offsets = [0, 0], sizes = [8, 16], strides = [1, 1]} : vector<16x32xf32> to vector<8x16xf32>
    %cst_15 = arith.constant dense<0.000000e+00> : vector<8x8xf32>
    %32 = tpu.matmul %29, %30, %cst_15 {dimension_numbers = #tpu.dot_dimension_numbers<[1], [1], [0], [0], [0, 0, 1, 0], [], []>} : vector<8x16xf32>, vector<8x16xf32>, vector<8x8xf32> -> vector<8x8xf32>
    %cst_16 = arith.constant 2.500000e-01 : f32
    %33 = vector.broadcast %cst_16 : f32 to vector<8x8xf32>
    %34 = arith.mulf %32, %33 : vector<8x8xf32>
    %cst_17 = arith.constant dense<0xFF800000> : vector<8xf32>
    %35 = vector.multi_reduction <maximumf>, %34, %cst_17 [1] : vector<8x8xf32> to vector<8xf32>
    %36 = vector.shape_cast %35 : vector<8xf32> to vector<8x1xf32>
    %37 = vector.broadcast %36 : vector<8x1xf32> to vector<8x8xf32>
    %38 = arith.subf %34, %37 : vector<8x8xf32>
    %39 = math.exp %38 : vector<8x8xf32>
    %cst_18 = arith.constant dense<0.000000e+00> : vector<8xf32>
    %40 = vector.multi_reduction <add>, %39, %cst_18 [1] : vector<8x8xf32> to vector<8xf32>
    %41 = vector.shape_cast %40 : vector<8xf32> to vector<8x1xf32>
    %42 = tpu.reciprocal %41 {approx = true} : vector<8x1xf32> -> vector<8x1xf32>
    %43 = vector.broadcast %42 : vector<8x1xf32> to vector<8x8xf32>
    %44 = arith.mulf %39, %43 : vector<8x8xf32>
    %cst_19 = arith.constant dense<0.000000e+00> : vector<8x16xf32>
    %45 = tpu.matmul %44, %31, %cst_19 {dimension_numbers = #tpu.dot_dimension_numbers<[1], [0], [0], [1], [0, 0, 1, 1], [], []>} : vector<8x8xf32>, vector<8x16xf32>, vector<8x16xf32> -> vector<8x16xf32>
    %46 = vector.extract_strided_slice %24 {offsets = [0, 16], sizes = [8, 16], strides = [1, 1]} : vector<16x32xf32> to vector<8x16xf32>
    %47 = vector.extract_strided_slice %27 {offsets = [0, 16], sizes = [8, 16], strides = [1, 1]} : vector<16x32xf32> to vector<8x16xf32>
    %48 = vector.extract_strided_slice %28 {offsets = [0, 16], sizes = [8, 16], strides = [1, 1]} : vector<16x32xf32> to vector<8x16xf32>
    %cst_20 = arith.constant dense<0.000000e+00> : vector<8x8xf32>
    %49 = tpu.matmul %46, %47, %cst_20 {dimension_numbers = #tpu.dot_dimension_numbers<[1], [1], [0], [0], [0, 0, 1, 0], [], []>} : vector<8x16xf32>, vector<8x16xf32>, vector<8x8xf32> -> vector<8x8xf32>
    %cst_21 = arith.constant 2.500000e-01 : f32
    %50 = vector.broadcast %cst_21 : f32 to vector<8x8xf32>
    %51 = arith.mulf %49, %50 : vector<8x8xf32>
    %cst_22 = arith.constant dense<0xFF800000> : vector<8xf32>
    %52 = vector.multi_reduction <maximumf>, %51, %cst_22 [1] : vector<8x8xf32> to vector<8xf32>
    %53 = vector.shape_cast %52 : vector<8xf32> to vector<8x1xf32>
    %54 = vector.broadcast %53 : vector<8x1xf32> to vector<8x8xf32>
    %55 = arith.subf %51, %54 : vector<8x8xf32>
    %56 = math.exp %55 : vector<8x8xf32>
    %cst_23 = arith.constant dense<0.000000e+00> : vector<8xf32>
    %57 = vector.multi_reduction <add>, %56, %cst_23 [1] : vector<8x8xf32> to vector<8xf32>
    %58 = vector.shape_cast %57 : vector<8xf32> to vector<8x1xf32>
    %59 = tpu.reciprocal %58 {approx = true} : vector<8x1xf32> -> vector<8x1xf32>
    %60 = vector.broadcast %59 : vector<8x1xf32> to vector<8x8xf32>
    %61 = arith.mulf %56, %60 : vector<8x8xf32>
    %cst_24 = arith.constant dense<0.000000e+00> : vector<8x16xf32>
    %62 = tpu.matmul %61, %48, %cst_24 {dimension_numbers = #tpu.dot_dimension_numbers<[1], [0], [0], [1], [0, 0, 1, 1], [], []>} : vector<8x8xf32>, vector<8x16xf32>, vector<8x16xf32> -> vector<8x16xf32>
    %63 = tpu.concatenate %45, %62 in 1 : vector<8x16xf32>, vector<8x16xf32> -> vector<8x32xf32>
    %64 = vector.extract_strided_slice %24 {offsets = [8, 0], sizes = [8, 16], strides = [1, 1]} : vector<16x32xf32> to vector<8x16xf32>
    %65 = vector.extract_strided_slice %27 {offsets = [8, 0], sizes = [8, 16], strides = [1, 1]} : vector<16x32xf32> to vector<8x16xf32>
    %66 = vector.extract_strided_slice %28 {offsets = [8, 0], sizes = [8, 16], strides = [1, 1]} : vector<16x32xf32> to vector<8x16xf32>
    %cst_25 = arith.constant dense<0.000000e+00> : vector<8x8xf32>
    %67 = tpu.matmul %64, %65, %cst_25 {dimension_numbers = #tpu.dot_dimension_numbers<[1], [1], [0], [0], [0, 0, 1, 0], [], []>} : vector<8x16xf32>, vector<8x16xf32>, vector<8x8xf32> -> vector<8x8xf32>
    %cst_26 = arith.constant 2.500000e-01 : f32
    %68 = vector.broadcast %cst_26 : f32 to vector<8x8xf32>
    %69 = arith.mulf %67, %68 : vector<8x8xf32>
    %cst_27 = arith.constant dense<0xFF800000> : vector<8xf32>
    %70 = vector.multi_reduction <maximumf>, %69, %cst_27 [1] : vector<8x8xf32> to vector<8xf32>
    %71 = vector.shape_cast %70 : vector<8xf32> to vector<8x1xf32>
    %72 = vector.broadcast %71 : vector<8x1xf32> to vector<8x8xf32>
    %73 = arith.subf %69, %72 : vector<8x8xf32>
    %74 = math.exp %73 : vector<8x8xf32>
    %cst_28 = arith.constant dense<0.000000e+00> : vector<8xf32>
    %75 = vector.multi_reduction <add>, %74, %cst_28 [1] : vector<8x8xf32> to vector<8xf32>
    %76 = vector.shape_cast %75 : vector<8xf32> to vector<8x1xf32>
    %77 = tpu.reciprocal %76 {approx = true} : vector<8x1xf32> -> vector<8x1xf32>
    %78 = vector.broadcast %77 : vector<8x1xf32> to vector<8x8xf32>
    %79 = arith.mulf %74, %78 : vector<8x8xf32>
    %cst_29 = arith.constant dense<0.000000e+00> : vector<8x16xf32>
    %80 = tpu.matmul %79, %66, %cst_29 {dimension_numbers = #tpu.dot_dimension_numbers<[1], [0], [0], [1], [0, 0, 1, 1], [], []>} : vector<8x8xf32>, vector<8x16xf32>, vector<8x16xf32> -> vector<8x16xf32>
    %81 = vector.extract_strided_slice %24 {offsets = [8, 16], sizes = [8, 16], strides = [1, 1]} : vector<16x32xf32> to vector<8x16xf32>
    %82 = vector.extract_strided_slice %27 {offsets = [8, 16], sizes = [8, 16], strides = [1, 1]} : vector<16x32xf32> to vector<8x16xf32>
    %83 = vector.extract_strided_slice %28 {offsets = [8, 16], sizes = [8, 16], strides = [1, 1]} : vector<16x32xf32> to vector<8x16xf32>
    %cst_30 = arith.constant dense<0.000000e+00> : vector<8x8xf32>
    %84 = tpu.matmul %81, %82, %cst_30 {dimension_numbers = #tpu.dot_dimension_numbers<[1], [1], [0], [0], [0, 0, 1, 0], [], []>} : vector<8x16xf32>, vector<8x16xf32>, vector<8x8xf32> -> vector<8x8xf32>
    %cst_31 = arith.constant 2.500000e-01 : f32
    %85 = vector.broadcast %cst_31 : f32 to vector<8x8xf32>
    %86 = arith.mulf %84, %85 : vector<8x8xf32>
    %cst_32 = arith.constant dense<0xFF800000> : vector<8xf32>
    %87 = vector.multi_reduction <maximumf>, %86, %cst_32 [1] : vector<8x8xf32> to vector<8xf32>
    %88 = vector.shape_cast %87 : vector<8xf32> to vector<8x1xf32>
    %89 = vector.broadcast %88 : vector<8x1xf32> to vector<8x8xf32>
    %90 = arith.subf %86, %89 : vector<8x8xf32>
    %91 = math.exp %90 : vector<8x8xf32>
    %cst_33 = arith.constant dense<0.000000e+00> : vector<8xf32>
    %92 = vector.multi_reduction <add>, %91, %cst_33 [1] : vector<8x8xf32> to vector<8xf32>
    %93 = vector.shape_cast %92 : vector<8xf32> to vector<8x1xf32>
    %94 = tpu.reciprocal %93 {approx = true} : vector<8x1xf32> -> vector<8x1xf32>
    %95 = vector.broadcast %94 : vector<8x1xf32> to vector<8x8xf32>
    %96 = arith.mulf %91, %95 : vector<8x8xf32>
    %cst_34 = arith.constant dense<0.000000e+00> : vector<8x16xf32>
    %97 = tpu.matmul %96, %83, %cst_34 {dimension_numbers = #tpu.dot_dimension_numbers<[1], [0], [0], [1], [0, 0, 1, 1], [], []>} : vector<8x8xf32>, vector<8x16xf32>, vector<8x16xf32> -> vector<8x16xf32>
    %98 = tpu.concatenate %80, %97 in 1 : vector<8x16xf32>, vector<8x16xf32> -> vector<8x32xf32>
    %99 = tpu.concatenate %63, %98 in 0 : vector<8x32xf32>, vector<8x32xf32> -> vector<16x32xf32>
    %c0_35 = arith.constant 0 : index
    %c0_36 = arith.constant 0 : index
    %100 = vector.load %arg5[%c0_35, %c0_36] : memref<32x32xf32, #tpu.memory_space<vmem>>, vector<32x32xf32>
    %cst_37 = arith.constant dense<0.000000e+00> : vector<16x32xf32>
    %101 = tpu.matmul %99, %100, %cst_37 {dimension_numbers = #tpu.dot_dimension_numbers<[1], [0], [0], [1], [0, 0, 1, 1], [], []>} : vector<16x32xf32>, vector<32x32xf32>, vector<16x32xf32> -> vector<16x32xf32>
    %c0_38 = arith.constant 0 : index
    %c0_39 = arith.constant 0 : index
    %102 = vector.load %arg6[%c0_38, %c0_39] : memref<1x32xf32, #tpu.memory_space<vmem>>, vector<1x32xf32>
    %103 = vector.broadcast %102 : vector<1x32xf32> to vector<16x32xf32>
    %104 = arith.addf %101, %103 : vector<16x32xf32>
    %105 = arith.addf %0, %104 : vector<16x32xf32>
    %cst_40 = arith.constant dense<0.000000e+00> : vector<16xf32>
    %106 = vector.multi_reduction <add>, %105, %cst_40 [1] : vector<16x32xf32> to vector<16xf32>
    %107 = vector.shape_cast %106 : vector<16xf32> to vector<16x1xf32>
    %cst_41 = arith.constant 3.200000e+01 : f32
    %108 = vector.broadcast %cst_41 : f32 to vector<16x1xf32>
    %109 = arith.divf %107, %108 : vector<16x1xf32>
    %110 = vector.broadcast %109 : vector<16x1xf32> to vector<16x32xf32>
    %111 = arith.subf %105, %110 : vector<16x32xf32>
    %112 = arith.mulf %111, %111 : vector<16x32xf32>
    %cst_42 = arith.constant dense<0.000000e+00> : vector<16xf32>
    %113 = vector.multi_reduction <add>, %112, %cst_42 [1] : vector<16x32xf32> to vector<16xf32>
    %114 = vector.shape_cast %113 : vector<16xf32> to vector<16x1xf32>
    %cst_43 = arith.constant 3.200000e+01 : f32
    %115 = vector.broadcast %cst_43 : f32 to vector<16x1xf32>
    %116 = arith.divf %114, %115 : vector<16x1xf32>
    %cst_44 = arith.constant 9.99999974E-6 : f32
    %117 = vector.broadcast %cst_44 : f32 to vector<16x1xf32>
    %118 = arith.addf %116, %117 : vector<16x1xf32>
    %119 = math.rsqrt %118 : vector<16x1xf32>
    %120 = vector.broadcast %119 : vector<16x1xf32> to vector<16x32xf32>
    %121 = arith.mulf %111, %120 : vector<16x32xf32>
    %c0_45 = arith.constant 0 : index
    %c0_46 = arith.constant 0 : index
    %122 = vector.load %arg7[%c0_45, %c0_46] : memref<1x32xf32, #tpu.memory_space<vmem>>, vector<1x32xf32>
    %123 = vector.broadcast %122 : vector<1x32xf32> to vector<16x32xf32>
    %124 = arith.mulf %121, %123 : vector<16x32xf32>
    %c0_47 = arith.constant 0 : index
    %c0_48 = arith.constant 0 : index
    %125 = vector.load %arg8[%c0_47, %c0_48] : memref<1x32xf32, #tpu.memory_space<vmem>>, vector<1x32xf32>
    %126 = vector.broadcast %125 : vector<1x32xf32> to vector<16x32xf32>
    %127 = arith.addf %124, %126 : vector<16x32xf32>
    %c0_49 = arith.constant 0 : index
    %c0_50 = arith.constant 0 : index
    %128 = vector.load %arg9[%c0_49, %c0_50] : memref<32x64xf32, #tpu.memory_space<vmem>>, vector<32x64xf32>
    %cst_51 = arith.constant dense<0.000000e+00> : vector<16x64xf32>
    %129 = tpu.matmul %127, %128, %cst_51 {dimension_numbers = #tpu.dot_dimension_numbers<[1], [0], [0], [1], [0, 0, 1, 1], [], []>} : vector<16x32xf32>, vector<32x64xf32>, vector<16x64xf32> -> vector<16x64xf32>
    %c0_52 = arith.constant 0 : index
    %c0_53 = arith.constant 0 : index
    %130 = vector.load %arg10[%c0_52, %c0_53] : memref<1x64xf32, #tpu.memory_space<vmem>>, vector<1x64xf32>
    %131 = vector.broadcast %130 : vector<1x64xf32> to vector<16x64xf32>
    %132 = arith.addf %129, %131 : vector<16x64xf32>
    %cst_54 = arith.constant 5.000000e-01 : f32
    %133 = vector.broadcast %cst_54 : f32 to vector<16x64xf32>
    %134 = arith.mulf %133, %132 : vector<16x64xf32>
    %cst_55 = arith.constant 0.707106769 : f32
    %135 = vector.broadcast %cst_55 : f32 to vector<16x64xf32>
    %136 = arith.mulf %132, %135 : vector<16x64xf32>
    %137 = math.absf %136 : vector<16x64xf32>
    %cst_56 = arith.constant 0.327591091 : f32
    %138 = vector.broadcast %cst_56 : f32 to vector<16x64xf32>
    %139 = arith.mulf %138, %137 : vector<16x64xf32>
    %cst_57 = arith.constant 1.000000e+00 : f32
    %140 = vector.broadcast %cst_57 : f32 to vector<16x64xf32>
    %141 = arith.addf %140, %139 : vector<16x64xf32>
    %cst_58 = arith.constant 1.000000e+00 : f32
    %142 = vector.broadcast %cst_58 : f32 to vector<16x64xf32>
    %143 = arith.divf %142, %141 : vector<16x64xf32>
    %cst_59 = arith.constant 1.06140542 : f32
    %144 = vector.broadcast %cst_59 : f32 to vector<16x64xf32>
    %145 = arith.mulf %143, %144 : vector<16x64xf32>
    %cst_60 = arith.constant -1.45315206 : f32
    %146 = vector.broadcast %cst_60 : f32 to vector<16x64xf32>
    %147 = arith.addf %146, %145 : vector<16x64xf32>
    %148 = arith.mulf %143, %147 : vector<16x64xf32>
    %cst_61 = arith.constant 1.42141378 : f32
    %149 = vector.broadcast %cst_61 : f32 to vector<16x64xf32>
    %150 = arith.addf %149, %148 : vector<16x64xf32>
    %151 = arith.mulf %143, %150 : vector<16x64xf32>
    %cst_62 = arith.constant -0.284496725 : f32
    %152 = vector.broadcast %cst_62 : f32 to vector<16x64xf32>
    %153 = arith.addf %152, %151 : vector<16x64xf32>
    %154 = arith.mulf %143, %153 : vector<16x64xf32>
    %cst_63 = arith.constant 0.254829586 : f32
    %155 = vector.broadcast %cst_63 : f32 to vector<16x64xf32>
    %156 = arith.addf %155, %154 : vector<16x64xf32>
    %157 = arith.mulf %143, %156 : vector<16x64xf32>
    %cst_64 = arith.constant 0.000000e+00 : f32
    %158 = vector.broadcast %cst_64 : f32 to vector<16x64xf32>
    %159 = arith.subf %158, %137 : vector<16x64xf32>
    %160 = arith.mulf %159, %137 : vector<16x64xf32>
    %161 = math.exp %160 : vector<16x64xf32>
    %162 = arith.mulf %157, %161 : vector<16x64xf32>
    %cst_65 = arith.constant 1.000000e+00 : f32
    %163 = vector.broadcast %cst_65 : f32 to vector<16x64xf32>
    %164 = arith.subf %163, %162 : vector<16x64xf32>
    %cst_66 = arith.constant 0.000000e+00 : f32
    %165 = vector.broadcast %cst_66 : f32 to vector<16x64xf32>
    %166 = arith.cmpf oge, %136, %165 : vector<16x64xf32>
    %cst_67 = arith.constant 0.000000e+00 : f32
    %167 = vector.broadcast %cst_67 : f32 to vector<16x64xf32>
    %168 = arith.subf %167, %164 : vector<16x64xf32>
    %169 = arith.select %166, %164, %168 : vector<16x64xi1>, vector<16x64xf32>
    %cst_68 = arith.constant 1.000000e+00 : f32
    %170 = vector.broadcast %cst_68 : f32 to vector<16x64xf32>
    %171 = arith.addf %170, %169 : vector<16x64xf32>
    %172 = arith.mulf %134, %171 : vector<16x64xf32>
    %c0_69 = arith.constant 0 : index
    %c0_70 = arith.constant 0 : index
    %173 = vector.load %arg11[%c0_69, %c0_70] : memref<64x32xf32, #tpu.memory_space<vmem>>, vector<64x32xf32>
    %cst_71 = arith.constant dense<0.000000e+00> : vector<16x32xf32>
    %174 = tpu.matmul %172, %173, %cst_71 {dimension_numbers = #tpu.dot_dimension_numbers<[1], [0], [0], [1], [0, 0, 1, 1], [], []>} : vector<16x64xf32>, vector<64x32xf32>, vector<16x32xf32> -> vector<16x32xf32>
    %c0_72 = arith.constant 0 : index
    %c0_73 = arith.constant 0 : index
    %175 = vector.load %arg12[%c0_72, %c0_73] : memref<1x32xf32, #tpu.memory_space<vmem>>, vector<1x32xf32>
    %176 = vector.broadcast %175 : vector<1x32xf32> to vector<16x32xf32>
    %177 = arith.addf %174, %176 : vector<16x32xf32>
    %178 = arith.addf %105, %177 : vector<16x32xf32>
    %cst_74 = arith.constant dense<0.000000e+00> : vector<16xf32>
    %179 = vector.multi_reduction <add>, %178, %cst_74 [1] : vector<16x32xf32> to vector<16xf32>
    %180 = vector.shape_cast %179 : vector<16xf32> to vector<16x1xf32>
    %cst_75 = arith.constant 3.200000e+01 : f32
    %181 = vector.broadcast %cst_75 : f32 to vector<16x1xf32>
    %182 = arith.divf %180, %181 : vector<16x1xf32>
    %183 = vector.broadcast %182 : vector<16x1xf32> to vector<16x32xf32>
    %184 = arith.subf %178, %183 : vector<16x32xf32>
    %185 = arith.mulf %184, %184 : vector<16x32xf32>
    %cst_76 = arith.constant dense<0.000000e+00> : vector<16xf32>
    %186 = vector.multi_reduction <add>, %185, %cst_76 [1] : vector<16x32xf32> to vector<16xf32>
    %187 = vector.shape_cast %186 : vector<16xf32> to vector<16x1xf32>
    %cst_77 = arith.constant 3.200000e+01 : f32
    %188 = vector.broadcast %cst_77 : f32 to vector<16x1xf32>
    %189 = arith.divf %187, %188 : vector<16x1xf32>
    %cst_78 = arith.constant 9.99999974E-6 : f32
    %190 = vector.broadcast %cst_78 : f32 to vector<16x1xf32>
    %191 = arith.addf %189, %190 : vector<16x1xf32>
    %192 = math.rsqrt %191 : vector<16x1xf32>
    %193 = vector.broadcast %192 : vector<16x1xf32> to vector<16x32xf32>
    %194 = arith.mulf %184, %193 : vector<16x32xf32>
    %c0_79 = arith.constant 0 : index
    %c0_80 = arith.constant 0 : index
    %195 = vector.load %arg13[%c0_79, %c0_80] : memref<1x32xf32, #tpu.memory_space<vmem>>, vector<1x32xf32>
    %196 = vector.broadcast %195 : vector<1x32xf32> to vector<16x32xf32>
    %197 = arith.mulf %194, %196 : vector<16x32xf32>
    %c0_81 = arith.constant 0 : index
    %c0_82 = arith.constant 0 : index
    %198 = vector.load %arg14[%c0_81, %c0_82] : memref<1x32xf32, #tpu.memory_space<vmem>>, vector<1x32xf32>
    %199 = vector.broadcast %198 : vector<1x32xf32> to vector<16x32xf32>
    %200 = arith.addf %197, %199 : vector<16x32xf32>
    %c0_83 = arith.constant 0 : index
    %c0_84 = arith.constant 0 : index
    %201 = vector.load %arg15[%c0_83, %c0_84] : memref<32x32xf32, #tpu.memory_space<vmem>>, vector<32x32xf32>
    %cst_85 = arith.constant dense<0.000000e+00> : vector<16x32xf32>
    %202 = tpu.matmul %200, %201, %cst_85 {dimension_numbers = #tpu.dot_dimension_numbers<[1], [0], [0], [1], [0, 0, 1, 1], [], []>} : vector<16x32xf32>, vector<32x32xf32>, vector<16x32xf32> -> vector<16x32xf32>
    %c0_86 = arith.constant 0 : index
    %c0_87 = arith.constant 0 : index
    %203 = vector.load %arg16[%c0_86, %c0_87] : memref<32x64xf32, #tpu.memory_space<vmem>>, vector<32x64xf32>
    %cst_88 = arith.constant dense<0.000000e+00> : vector<16x64xf32>
    %204 = tpu.matmul %200, %203, %cst_88 {dimension_numbers = #tpu.dot_dimension_numbers<[1], [0], [0], [1], [0, 0, 1, 1], [], []>} : vector<16x32xf32>, vector<32x64xf32>, vector<16x64xf32> -> vector<16x64xf32>
    %205 = vector.extract_strided_slice %204 {offsets = [0, 0], sizes = [16, 32], strides = [1, 1]} : vector<16x64xf32> to vector<16x32xf32>
    %206 = vector.extract_strided_slice %204 {offsets = [0, 32], sizes = [16, 32], strides = [1, 1]} : vector<16x64xf32> to vector<16x32xf32>
    %207 = vector.extract_strided_slice %202 {offsets = [0, 0], sizes = [8, 16], strides = [1, 1]} : vector<16x32xf32> to vector<8x16xf32>
    %208 = vector.extract_strided_slice %205 {offsets = [0, 0], sizes = [8, 16], strides = [1, 1]} : vector<16x32xf32> to vector<8x16xf32>
    %209 = vector.extract_strided_slice %206 {offsets = [0, 0], sizes = [8, 16], strides = [1, 1]} : vector<16x32xf32> to vector<8x16xf32>
    %cst_89 = arith.constant dense<0.000000e+00> : vector<8x8xf32>
    %210 = tpu.matmul %207, %208, %cst_89 {dimension_numbers = #tpu.dot_dimension_numbers<[1], [1], [0], [0], [0, 0, 1, 0], [], []>} : vector<8x16xf32>, vector<8x16xf32>, vector<8x8xf32> -> vector<8x8xf32>
    %cst_90 = arith.constant 2.500000e-01 : f32
    %211 = vector.broadcast %cst_90 : f32 to vector<8x8xf32>
    %212 = arith.mulf %210, %211 : vector<8x8xf32>
    %cst_91 = arith.constant dense<0xFF800000> : vector<8xf32>
    %213 = vector.multi_reduction <maximumf>, %212, %cst_91 [1] : vector<8x8xf32> to vector<8xf32>
    %214 = vector.shape_cast %213 : vector<8xf32> to vector<8x1xf32>
    %215 = vector.broadcast %214 : vector<8x1xf32> to vector<8x8xf32>
    %216 = arith.subf %212, %215 : vector<8x8xf32>
    %217 = math.exp %216 : vector<8x8xf32>
    %cst_92 = arith.constant dense<0.000000e+00> : vector<8xf32>
    %218 = vector.multi_reduction <add>, %217, %cst_92 [1] : vector<8x8xf32> to vector<8xf32>
    %219 = vector.shape_cast %218 : vector<8xf32> to vector<8x1xf32>
    %220 = tpu.reciprocal %219 {approx = true} : vector<8x1xf32> -> vector<8x1xf32>
    %221 = vector.broadcast %220 : vector<8x1xf32> to vector<8x8xf32>
    %222 = arith.mulf %217, %221 : vector<8x8xf32>
    %cst_93 = arith.constant dense<0.000000e+00> : vector<8x16xf32>
    %223 = tpu.matmul %222, %209, %cst_93 {dimension_numbers = #tpu.dot_dimension_numbers<[1], [0], [0], [1], [0, 0, 1, 1], [], []>} : vector<8x8xf32>, vector<8x16xf32>, vector<8x16xf32> -> vector<8x16xf32>
    %224 = vector.extract_strided_slice %202 {offsets = [0, 16], sizes = [8, 16], strides = [1, 1]} : vector<16x32xf32> to vector<8x16xf32>
    %225 = vector.extract_strided_slice %205 {offsets = [0, 16], sizes = [8, 16], strides = [1, 1]} : vector<16x32xf32> to vector<8x16xf32>
    %226 = vector.extract_strided_slice %206 {offsets = [0, 16], sizes = [8, 16], strides = [1, 1]} : vector<16x32xf32> to vector<8x16xf32>
    %cst_94 = arith.constant dense<0.000000e+00> : vector<8x8xf32>
    %227 = tpu.matmul %224, %225, %cst_94 {dimension_numbers = #tpu.dot_dimension_numbers<[1], [1], [0], [0], [0, 0, 1, 0], [], []>} : vector<8x16xf32>, vector<8x16xf32>, vector<8x8xf32> -> vector<8x8xf32>
    %cst_95 = arith.constant 2.500000e-01 : f32
    %228 = vector.broadcast %cst_95 : f32 to vector<8x8xf32>
    %229 = arith.mulf %227, %228 : vector<8x8xf32>
    %cst_96 = arith.constant dense<0xFF800000> : vector<8xf32>
    %230 = vector.multi_reduction <maximumf>, %229, %cst_96 [1] : vector<8x8xf32> to vector<8xf32>
    %231 = vector.shape_cast %230 : vector<8xf32> to vector<8x1xf32>
    %232 = vector.broadcast %231 : vector<8x1xf32> to vector<8x8xf32>
    %233 = arith.subf %229, %232 : vector<8x8xf32>
    %234 = math.exp %233 : vector<8x8xf32>
    %cst_97 = arith.constant dense<0.000000e+00> : vector<8xf32>
    %235 = vector.multi_reduction <add>, %234, %cst_97 [1] : vector<8x8xf32> to vector<8xf32>
    %236 = vector.shape_cast %235 : vector<8xf32> to vector<8x1xf32>
    %237 = tpu.reciprocal %236 {approx = true} : vector<8x1xf32> -> vector<8x1xf32>
    %238 = vector.broadcast %237 : vector<8x1xf32> to vector<8x8xf32>
    %239 = arith.mulf %234, %238 : vector<8x8xf32>
    %cst_98 = arith.constant dense<0.000000e+00> : vector<8x16xf32>
    %240 = tpu.matmul %239, %226, %cst_98 {dimension_numbers = #tpu.dot_dimension_numbers<[1], [0], [0], [1], [0, 0, 1, 1], [], []>} : vector<8x8xf32>, vector<8x16xf32>, vector<8x16xf32> -> vector<8x16xf32>
    %241 = tpu.concatenate %223, %240 in 1 : vector<8x16xf32>, vector<8x16xf32> -> vector<8x32xf32>
    %242 = vector.extract_strided_slice %202 {offsets = [8, 0], sizes = [8, 16], strides = [1, 1]} : vector<16x32xf32> to vector<8x16xf32>
    %243 = vector.extract_strided_slice %205 {offsets = [8, 0], sizes = [8, 16], strides = [1, 1]} : vector<16x32xf32> to vector<8x16xf32>
    %244 = vector.extract_strided_slice %206 {offsets = [8, 0], sizes = [8, 16], strides = [1, 1]} : vector<16x32xf32> to vector<8x16xf32>
    %cst_99 = arith.constant dense<0.000000e+00> : vector<8x8xf32>
    %245 = tpu.matmul %242, %243, %cst_99 {dimension_numbers = #tpu.dot_dimension_numbers<[1], [1], [0], [0], [0, 0, 1, 0], [], []>} : vector<8x16xf32>, vector<8x16xf32>, vector<8x8xf32> -> vector<8x8xf32>
    %cst_100 = arith.constant 2.500000e-01 : f32
    %246 = vector.broadcast %cst_100 : f32 to vector<8x8xf32>
    %247 = arith.mulf %245, %246 : vector<8x8xf32>
    %cst_101 = arith.constant dense<0xFF800000> : vector<8xf32>
    %248 = vector.multi_reduction <maximumf>, %247, %cst_101 [1] : vector<8x8xf32> to vector<8xf32>
    %249 = vector.shape_cast %248 : vector<8xf32> to vector<8x1xf32>
    %250 = vector.broadcast %249 : vector<8x1xf32> to vector<8x8xf32>
    %251 = arith.subf %247, %250 : vector<8x8xf32>
    %252 = math.exp %251 : vector<8x8xf32>
    %cst_102 = arith.constant dense<0.000000e+00> : vector<8xf32>
    %253 = vector.multi_reduction <add>, %252, %cst_102 [1] : vector<8x8xf32> to vector<8xf32>
    %254 = vector.shape_cast %253 : vector<8xf32> to vector<8x1xf32>
    %255 = tpu.reciprocal %254 {approx = true} : vector<8x1xf32> -> vector<8x1xf32>
    %256 = vector.broadcast %255 : vector<8x1xf32> to vector<8x8xf32>
    %257 = arith.mulf %252, %256 : vector<8x8xf32>
    %cst_103 = arith.constant dense<0.000000e+00> : vector<8x16xf32>
    %258 = tpu.matmul %257, %244, %cst_103 {dimension_numbers = #tpu.dot_dimension_numbers<[1], [0], [0], [1], [0, 0, 1, 1], [], []>} : vector<8x8xf32>, vector<8x16xf32>, vector<8x16xf32> -> vector<8x16xf32>
    %259 = vector.extract_strided_slice %202 {offsets = [8, 16], sizes = [8, 16], strides = [1, 1]} : vector<16x32xf32> to vector<8x16xf32>
    %260 = vector.extract_strided_slice %205 {offsets = [8, 16], sizes = [8, 16], strides = [1, 1]} : vector<16x32xf32> to vector<8x16xf32>
    %261 = vector.extract_strided_slice %206 {offsets = [8, 16], sizes = [8, 16], strides = [1, 1]} : vector<16x32xf32> to vector<8x16xf32>
    %cst_104 = arith.constant dense<0.000000e+00> : vector<8x8xf32>
    %262 = tpu.matmul %259, %260, %cst_104 {dimension_numbers = #tpu.dot_dimension_numbers<[1], [1], [0], [0], [0, 0, 1, 0], [], []>} : vector<8x16xf32>, vector<8x16xf32>, vector<8x8xf32> -> vector<8x8xf32>
    %cst_105 = arith.constant 2.500000e-01 : f32
    %263 = vector.broadcast %cst_105 : f32 to vector<8x8xf32>
    %264 = arith.mulf %262, %263 : vector<8x8xf32>
    %cst_106 = arith.constant dense<0xFF800000> : vector<8xf32>
    %265 = vector.multi_reduction <maximumf>, %264, %cst_106 [1] : vector<8x8xf32> to vector<8xf32>
    %266 = vector.shape_cast %265 : vector<8xf32> to vector<8x1xf32>
    %267 = vector.broadcast %266 : vector<8x1xf32> to vector<8x8xf32>
    %268 = arith.subf %264, %267 : vector<8x8xf32>
    %269 = math.exp %268 : vector<8x8xf32>
    %cst_107 = arith.constant dense<0.000000e+00> : vector<8xf32>
    %270 = vector.multi_reduction <add>, %269, %cst_107 [1] : vector<8x8xf32> to vector<8xf32>
    %271 = vector.shape_cast %270 : vector<8xf32> to vector<8x1xf32>
    %272 = tpu.reciprocal %271 {approx = true} : vector<8x1xf32> -> vector<8x1xf32>
    %273 = vector.broadcast %272 : vector<8x1xf32> to vector<8x8xf32>
    %274 = arith.mulf %269, %273 : vector<8x8xf32>
    %cst_108 = arith.constant dense<0.000000e+00> : vector<8x16xf32>
    %275 = tpu.matmul %274, %261, %cst_108 {dimension_numbers = #tpu.dot_dimension_numbers<[1], [0], [0], [1], [0, 0, 1, 1], [], []>} : vector<8x8xf32>, vector<8x16xf32>, vector<8x16xf32> -> vector<8x16xf32>
    %276 = tpu.concatenate %258, %275 in 1 : vector<8x16xf32>, vector<8x16xf32> -> vector<8x32xf32>
    %277 = tpu.concatenate %241, %276 in 0 : vector<8x32xf32>, vector<8x32xf32> -> vector<16x32xf32>
    %c0_109 = arith.constant 0 : index
    %c0_110 = arith.constant 0 : index
    %278 = vector.load %arg17[%c0_109, %c0_110] : memref<32x32xf32, #tpu.memory_space<vmem>>, vector<32x32xf32>
    %cst_111 = arith.constant dense<0.000000e+00> : vector<16x32xf32>
    %279 = tpu.matmul %277, %278, %cst_111 {dimension_numbers = #tpu.dot_dimension_numbers<[1], [0], [0], [1], [0, 0, 1, 1], [], []>} : vector<16x32xf32>, vector<32x32xf32>, vector<16x32xf32> -> vector<16x32xf32>
    %c0_112 = arith.constant 0 : index
    %c0_113 = arith.constant 0 : index
    %280 = vector.load %arg18[%c0_112, %c0_113] : memref<1x32xf32, #tpu.memory_space<vmem>>, vector<1x32xf32>
    %281 = vector.broadcast %280 : vector<1x32xf32> to vector<16x32xf32>
    %282 = arith.addf %279, %281 : vector<16x32xf32>
    %283 = arith.addf %178, %282 : vector<16x32xf32>
    %cst_114 = arith.constant dense<0.000000e+00> : vector<16xf32>
    %284 = vector.multi_reduction <add>, %283, %cst_114 [1] : vector<16x32xf32> to vector<16xf32>
    %285 = vector.shape_cast %284 : vector<16xf32> to vector<16x1xf32>
    %cst_115 = arith.constant 3.200000e+01 : f32
    %286 = vector.broadcast %cst_115 : f32 to vector<16x1xf32>
    %287 = arith.divf %285, %286 : vector<16x1xf32>
    %288 = vector.broadcast %287 : vector<16x1xf32> to vector<16x32xf32>
    %289 = arith.subf %283, %288 : vector<16x32xf32>
    %290 = arith.mulf %289, %289 : vector<16x32xf32>
    %cst_116 = arith.constant dense<0.000000e+00> : vector<16xf32>
    %291 = vector.multi_reduction <add>, %290, %cst_116 [1] : vector<16x32xf32> to vector<16xf32>
    %292 = vector.shape_cast %291 : vector<16xf32> to vector<16x1xf32>
    %cst_117 = arith.constant 3.200000e+01 : f32
    %293 = vector.broadcast %cst_117 : f32 to vector<16x1xf32>
    %294 = arith.divf %292, %293 : vector<16x1xf32>
    %cst_118 = arith.constant 9.99999974E-6 : f32
    %295 = vector.broadcast %cst_118 : f32 to vector<16x1xf32>
    %296 = arith.addf %294, %295 : vector<16x1xf32>
    %297 = math.rsqrt %296 : vector<16x1xf32>
    %298 = vector.broadcast %297 : vector<16x1xf32> to vector<16x32xf32>
    %299 = arith.mulf %289, %298 : vector<16x32xf32>
    %c0_119 = arith.constant 0 : index
    %c0_120 = arith.constant 0 : index
    %300 = vector.load %arg19[%c0_119, %c0_120] : memref<1x32xf32, #tpu.memory_space<vmem>>, vector<1x32xf32>
    %301 = vector.broadcast %300 : vector<1x32xf32> to vector<16x32xf32>
    %302 = arith.mulf %299, %301 : vector<16x32xf32>
    %c0_121 = arith.constant 0 : index
    %c0_122 = arith.constant 0 : index
    %303 = vector.load %arg20[%c0_121, %c0_122] : memref<1x32xf32, #tpu.memory_space<vmem>>, vector<1x32xf32>
    %304 = vector.broadcast %303 : vector<1x32xf32> to vector<16x32xf32>
    %305 = arith.addf %302, %304 : vector<16x32xf32>
    %c0_123 = arith.constant 0 : index
    %c0_124 = arith.constant 0 : index
    %306 = vector.load %arg21[%c0_123, %c0_124] : memref<32x64xf32, #tpu.memory_space<vmem>>, vector<32x64xf32>
    %cst_125 = arith.constant dense<0.000000e+00> : vector<16x64xf32>
    %307 = tpu.matmul %305, %306, %cst_125 {dimension_numbers = #tpu.dot_dimension_numbers<[1], [0], [0], [1], [0, 0, 1, 1], [], []>} : vector<16x32xf32>, vector<32x64xf32>, vector<16x64xf32> -> vector<16x64xf32>
    %c0_126 = arith.constant 0 : index
    %c0_127 = arith.constant 0 : index
    %308 = vector.load %arg22[%c0_126, %c0_127] : memref<1x64xf32, #tpu.memory_space<vmem>>, vector<1x64xf32>
    %309 = vector.broadcast %308 : vector<1x64xf32> to vector<16x64xf32>
    %310 = arith.addf %307, %309 : vector<16x64xf32>
    %cst_128 = arith.constant 5.000000e-01 : f32
    %311 = vector.broadcast %cst_128 : f32 to vector<16x64xf32>
    %312 = arith.mulf %311, %310 : vector<16x64xf32>
    %cst_129 = arith.constant 0.707106769 : f32
    %313 = vector.broadcast %cst_129 : f32 to vector<16x64xf32>
    %314 = arith.mulf %310, %313 : vector<16x64xf32>
    %315 = math.absf %314 : vector<16x64xf32>
    %cst_130 = arith.constant 0.327591091 : f32
    %316 = vector.broadcast %cst_130 : f32 to vector<16x64xf32>
    %317 = arith.mulf %316, %315 : vector<16x64xf32>
    %cst_131 = arith.constant 1.000000e+00 : f32
    %318 = vector.broadcast %cst_131 : f32 to vector<16x64xf32>
    %319 = arith.addf %318, %317 : vector<16x64xf32>
    %cst_132 = arith.constant 1.000000e+00 : f32
    %320 = vector.broadcast %cst_132 : f32 to vector<16x64xf32>
    %321 = arith.divf %320, %319 : vector<16x64xf32>
    %cst_133 = arith.constant 1.06140542 : f32
    %322 = vector.broadcast %cst_133 : f32 to vector<16x64xf32>
    %323 = arith.mulf %321, %322 : vector<16x64xf32>
    %cst_134 = arith.constant -1.45315206 : f32
    %324 = vector.broadcast %cst_134 : f32 to vector<16x64xf32>
    %325 = arith.addf %324, %323 : vector<16x64xf32>
    %326 = arith.mulf %321, %325 : vector<16x64xf32>
    %cst_135 = arith.constant 1.42141378 : f32
    %327 = vector.broadcast %cst_135 : f32 to vector<16x64xf32>
    %328 = arith.addf %327, %326 : vector<16x64xf32>
    %329 = arith.mulf %321, %328 : vector<16x64xf32>
    %cst_136 = arith.constant -0.284496725 : f32
    %330 = vector.broadcast %cst_136 : f32 to vector<16x64xf32>
    %331 = arith.addf %330, %329 : vector<16x64xf32>
    %332 = arith.mulf %321, %331 : vector<16x64xf32>
    %cst_137 = arith.constant 0.254829586 : f32
    %333 = vector.broadcast %cst_137 : f32 to vector<16x64xf32>
    %334 = arith.addf %333, %332 : vector<16x64xf32>
    %335 = arith.mulf %321, %334 : vector<16x64xf32>
    %cst_138 = arith.constant 0.000000e+00 : f32
    %336 = vector.broadcast %cst_138 : f32 to vector<16x64xf32>
    %337 = arith.subf %336, %315 : vector<16x64xf32>
    %338 = arith.mulf %337, %315 : vector<16x64xf32>
    %339 = math.exp %338 : vector<16x64xf32>
    %340 = arith.mulf %335, %339 : vector<16x64xf32>
    %cst_139 = arith.constant 1.000000e+00 : f32
    %341 = vector.broadcast %cst_139 : f32 to vector<16x64xf32>
    %342 = arith.subf %341, %340 : vector<16x64xf32>
    %cst_140 = arith.constant 0.000000e+00 : f32
    %343 = vector.broadcast %cst_140 : f32 to vector<16x64xf32>
    %344 = arith.cmpf oge, %314, %343 : vector<16x64xf32>
    %cst_141 = arith.constant 0.000000e+00 : f32
    %345 = vector.broadcast %cst_141 : f32 to vector<16x64xf32>
    %346 = arith.subf %345, %342 : vector<16x64xf32>
    %347 = arith.select %344, %342, %346 : vector<16x64xi1>, vector<16x64xf32>
    %cst_142 = arith.constant 1.000000e+00 : f32
    %348 = vector.broadcast %cst_142 : f32 to vector<16x64xf32>
    %349 = arith.addf %348, %347 : vector<16x64xf32>
    %350 = arith.mulf %312, %349 : vector<16x64xf32>
    %c0_143 = arith.constant 0 : index
    %c0_144 = arith.constant 0 : index
    %351 = vector.load %arg23[%c0_143, %c0_144] : memref<64x32xf32, #tpu.memory_space<vmem>>, vector<64x32xf32>
    %cst_145 = arith.constant dense<0.000000e+00> : vector<16x32xf32>
    %352 = tpu.matmul %350, %351, %cst_145 {dimension_numbers = #tpu.dot_dimension_numbers<[1], [0], [0], [1], [0, 0, 1, 1], [], []>} : vector<16x64xf32>, vector<64x32xf32>, vector<16x32xf32> -> vector<16x32xf32>
    %c0_146 = arith.constant 0 : index
    %c0_147 = arith.constant 0 : index
    %353 = vector.load %arg24[%c0_146, %c0_147] : memref<1x32xf32, #tpu.memory_space<vmem>>, vector<1x32xf32>
    %354 = vector.broadcast %353 : vector<1x32xf32> to vector<16x32xf32>
    %355 = arith.addf %352, %354 : vector<16x32xf32>
    %356 = arith.addf %283, %355 : vector<16x32xf32>
    %cst_148 = arith.constant dense<0.000000e+00> : vector<16xf32>
    %357 = vector.multi_reduction <add>, %356, %cst_148 [1] : vector<16x32xf32> to vector<16xf32>
    %358 = vector.shape_cast %357 : vector<16xf32> to vector<16x1xf32>
    %cst_149 = arith.constant 3.200000e+01 : f32
    %359 = vector.broadcast %cst_149 : f32 to vector<16x1xf32>
    %360 = arith.divf %358, %359 : vector<16x1xf32>
    %361 = vector.broadcast %360 : vector<16x1xf32> to vector<16x32xf32>
    %362 = arith.subf %356, %361 : vector<16x32xf32>
    %363 = arith.mulf %362, %362 : vector<16x32xf32>
    %cst_150 = arith.constant dense<0.000000e+00> : vector<16xf32>
    %364 = vector.multi_reduction <add>, %363, %cst_150 [1] : vector<16x32xf32> to vector<16xf32>
    %365 = vector.shape_cast %364 : vector<16xf32> to vector<16x1xf32>
    %cst_151 = arith.constant 3.200000e+01 : f32
    %366 = vector.broadcast %cst_151 : f32 to vector<16x1xf32>
    %367 = arith.divf %365, %366 : vector<16x1xf32>
    %cst_152 = arith.constant 9.99999974E-6 : f32
    %368 = vector.broadcast %cst_152 : f32 to vector<16x1xf32>
    %369 = arith.addf %367, %368 : vector<16x1xf32>
    %370 = math.rsqrt %369 : vector<16x1xf32>
    %371 = vector.broadcast %370 : vector<16x1xf32> to vector<16x32xf32>
    %372 = arith.mulf %362, %371 : vector<16x32xf32>
    %c0_153 = arith.constant 0 : index
    %c0_154 = arith.constant 0 : index
    %373 = vector.load %arg25[%c0_153, %c0_154] : memref<1x32xf32, #tpu.memory_space<vmem>>, vector<1x32xf32>
    %374 = vector.broadcast %373 : vector<1x32xf32> to vector<16x32xf32>
    %375 = arith.mulf %372, %374 : vector<16x32xf32>
    %c0_155 = arith.constant 0 : index
    %c0_156 = arith.constant 0 : index
    %376 = vector.load %arg26[%c0_155, %c0_156] : memref<1x32xf32, #tpu.memory_space<vmem>>, vector<1x32xf32>
    %377 = vector.broadcast %376 : vector<1x32xf32> to vector<16x32xf32>
    %378 = arith.addf %375, %377 : vector<16x32xf32>
    %c0_157 = arith.constant 0 : index
    %c0_158 = arith.constant 0 : index
    %379 = vector.load %arg27[%c0_157, %c0_158] : memref<16x32xf32, #tpu.memory_space<vmem>>, vector<16x32xf32>
    tpu.vector_store %arg27[%c0_157, %c0_158], %378 {strides = array<i32>} : memref<16x32xf32, #tpu.memory_space<vmem>>, vector<16x32xf32>,
    return
  }
}

</mosaic_0001>

<bundles_post_ra>
// kernel: tpu_custom_call.1
= control target key start
LH: loop header
LB: loop body
LE: loop exit
PB: predicated region body
PF: predicated region fallthrough
CT: control target
= control target key end

     0   :  { %s2436_s0 = inlined_call_operand.hbm [shape: f32[16,32], index: 0, kind: input, shape index: {}]   ;;  %s2437_s1 = inlined_call_operand.hbm [shape: f32[1,32], index: 1, kind: input, shape index: {}]   ;;  %s2438_s2 = inlined_call_operand.hbm [shape: f32[1,32], index: 2, kind: input, shape index: {}]   ;;  %s2439_s3 = inlined_call_operand.vmem [shape: f32[32,32], index: 3, kind: input, shape index: {}]   ;;  %s2440_s4 = inlined_call_operand.vmem [shape: f32[32,64], index: 4, kind: input, shape index: {}]   ;;  %s2441_s5 = inlined_call_operand.vmem [shape: f32[32,32], index: 5, kind: input, shape index: {}]   ;;  %s2442_s6 = inlined_call_operand.vmem [shape: f32[1,32], index: 6, kind: input, shape index: {}]   ;;  %s2443_s7 = inlined_call_operand.vmem [shape: f32[1,32], index: 7, kind: input, shape index: {}]   ;;  %s2444_s8 = inlined_call_operand.vmem [shape: f32[1,32], index: 8, kind: input, shape index: {}]   ;;  %s2445_s9 = inlined_call_operand.vmem [shape: f32[32,64], index: 9, kind: input, shape index: {}]   ;;  %s2446_s10 = inlined_call_operand.vmem [shape: f32[1,64], index: 10, kind: input, shape index: {}]   ;;  %s2447_s11 = inlined_call_operand.vmem [shape: f32[64,32], index: 11, kind: input, shape index: {}]   ;;  %s2448_s12 = inlined_call_operand.vmem [shape: f32[1,32], index: 12, kind: input, shape index: {}]   ;;  %s2449_s13 = inlined_call_operand.vmem [shape: f32[1,32], index: 13, kind: input, shape index: {}]   ;;  %s2450_s14 = inlined_call_operand.vmem [shape: f32[1,32], index: 14, kind: input, shape index: {}]   ;;  %s2451_s15 = inlined_call_operand.vmem [shape: f32[32,32], index: 15, kind: input, shape index: {}]   ;;  %s2452_s16 = inlined_call_operand.hbm [shape: f32[32,64], index: 16, kind: input, shape index: {}]   ;;  %s2453_s17 = inlined_call_operand.hbm [shape: f32[32,32], index: 17, kind: input, shape index: {}]   ;;  %s2454_s18 = inlined_call_operand.vmem [shape: f32[1,32], index: 18, kind: input, shape index: {}]   ;;  %s2455_s19 = inlined_call_operand.vmem [shape: f32[1,32], index: 19, kind: input, shape index: {}]   ;;  %s2456_s20 = inlined_call_operand.vmem [shape: f32[1,32], index: 20, kind: input, shape index: {}]   ;;  %s2457_s21 = inlined_call_operand.hbm [shape: f32[32,64], index: 21, kind: input, shape index: {}]   ;;  %s2458_s22 = inlined_call_operand.vmem [shape: f32[1,64], index: 22, kind: input, shape index: {}]   ;;  %s2459_s23 = inlined_call_operand.vmem [shape: f32[64,32], index: 23, kind: input, shape index: {}]   ;;  %s2460_s24 = inlined_call_operand.vmem [shape: f32[1,32], index: 24, kind: input, shape index: {}]   ;;  %s2461_s25 = inlined_call_operand.vmem [shape: f32[1,32], index: 25, kind: input, shape index: {}]   ;;  %s2462_s26 = inlined_call_operand.vmem [shape: f32[1,32], index: 26, kind: input, shape index: {}]   ;;  %s2463_s27 = inlined_call_operand.hbm [shape: f32[16,32], index: 27, kind: output, shape index: {}]  }
   0x1   :  { %2469 = sst [smem:[#allocation19_spill]] %s2436_s0 }
   0x2   :  { %2470 = sst [smem:[#allocation20_spill]] %s2437_s1 }
   0x3   :  { %2471 = sst [smem:[#allocation21_spill]] %s2438_s2 }
   0x4   :  { %2472 = sst [smem:[#allocation22_spill]] %s2439_s3 }
   0x5   :  { %2473 = sst [smem:[#allocation23_spill]] %s2440_s4 }
   0x6   :  { %2474 = sst [smem:[#allocation24_spill]] %s2441_s5 }
   0x7   :  { %2475 = sst [smem:[#allocation25_spill]] %s2442_s6 }
   0x8   :  { %2476 = sst [smem:[#allocation26_spill]] %s2443_s7 }
   0x9   :  { %2477 = sst [smem:[#allocation27_spill]] %s2444_s8 }
   0xa   :  { %2478 = sst [smem:[#allocation28_spill]] %s2445_s9 }
   0xb   :  { %2479 = sst [smem:[#allocation29_spill]] %s2446_s10 }
   0xc   :  { %2480 = sst [smem:[#allocation30_spill]] %s2447_s11 }
   0xd   :  { %32 = vsyncpa [#allocation3], 0 }
   0xe   :  { %33 = vsyncpa [#allocation6], 0 }
   0xf   :  { %34 = vsyncpa [#allocation9], 0 }
  0x10   :  { %35 = vsyncpa [#allocation12], 0  ;;  %s2481_s8 = sld [smem:[#allocation20_spill]] }
  0x16   :  { %s55_s30 = sshll.u32 %s2481_s8, 4  ;;  %s56_s30 = int_to_ptr.hbm [resolvable:$true] %s55_s30 }
  0x17   :  { %36 = vsyncpa [#allocation4], 0  ;;  %s1874_s9 = smov [#allocation5]   ;;  %s102_s10 = sshll.u32 %s2452_s16, 4  ;;  %s103_s10 = int_to_ptr.hbm [resolvable:$true] %s102_s10 }
  0x18   :  { %s57_s5 = sshll.u32 %s1874_s9, 4  ;;  %s1875_s29 = smov [#allocation8]   ;;  %s58_s5 = int_to_ptr.vmem [resolvable:$true] %s57_s5 }
  0x19   :  { %60 = dma.hbm_to_vmem [thread:$0]  %s56_s30, 16, %s58_s5, [#allocation6]  }
  0x1a   :  { %s104_s1 = sshll.u32 %s1875_s29, 4  ;;  %s2482_s2 = sld [smem:[#allocation19_spill]]  ;;  %s105_s1 = int_to_ptr.vmem [resolvable:$true] %s104_s1 }
  0x1b   :  { %s1876_s7 = smov 128   ;;  %s1877_s4 = smov 8  }
  0x1c   :  { %110 = dma.hbm_to_vmem [thread:$0]  %s103_s10, 512, %s105_s1, [#allocation9], %s1876_s7, %s1876_s7, %s1877_s4  }
  0x1d   :  { %s2483_s9 = sld [smem:[#allocation21_spill]]  ;;  %s1878_s16 = smov [#allocation2]  }
  0x1e   :  { %s43_s28 = sshll.u32 %s1878_s16, 4  ;;  %s1879_s0 = smov [#allocation7]   ;;  %s44_s28 = int_to_ptr.vmem [resolvable:$true] %s43_s28 }
  0x1f   :  { %s68_s29 = sshll.u32 %s1879_s0, 4  ;;  %s134_s8 = sshll.u32 %s2457_s21, 4  ;;  %s69_s29 = int_to_ptr.vmem [resolvable:$true] %s68_s29  ;;  %s135_s8 = int_to_ptr.hbm [resolvable:$true] %s134_s8 }
  0x20   :  { %s41_s3 = sshll.u32 %s2482_s2, 4  ;;  %s115_s2 = sshll.u32 %s2453_s17, 4  ;;  %s42_s3 = int_to_ptr.hbm [resolvable:$true] %s41_s3  ;;  %s116_s2 = int_to_ptr.hbm [resolvable:$true] %s115_s2 }
  0x21   :  { %49 = dma.hbm_to_vmem [thread:$0]  %s42_s3, 256, %s44_s28, [#allocation3], %s1876_s7, %s1876_s7, %s1877_s4  }
  0x22   :  { %s1880_s30 = smov [#allocation10]   ;;  %s1881_s3 = smov [#allocation11]  }
  0x23   :  { %s66_s5 = sshll.u32 %s2483_s9, 4  ;;  %s117_s9 = sshll.u32 %s1880_s30, 4  ;;  %s67_s5 = int_to_ptr.hbm [resolvable:$true] %s66_s5  ;;  %s118_s9 = int_to_ptr.vmem [resolvable:$true] %s117_s9 }
  0x24   :  { %71 = dma.hbm_to_vmem [thread:$0]  %s67_s5, 16, %s69_s29, [#allocation6]  }
  0x25   :  { %123 = dma.hbm_to_vmem [thread:$0]  %s116_s2, 512, %s118_s9, [#allocation9], %s1876_s7, %s1876_s7, %s1877_s4  }
  0x26   :  { %s136_s16 = sshll.u32 %s1881_s3, 4  ;;  %s137_s16 = int_to_ptr.vmem [resolvable:$true] %s136_s16 }
  0x27   :  { %142 = dma.hbm_to_vmem [thread:$0]  %s135_s8, 512, %s137_s16, [#allocation12], %s1876_s7, %s1876_s7, %s1877_s4  }
  0x28   :  { %1864 = dma.done.wait [#allocation3], 256  }
  0x29   :  { %1865 = vsyncadd [#allocation3], 4294967040 }
  0x2a   :  { %1866 = dma.done.wait [#allocation6], 32  }
  0x2b   :  { %1867 = vsyncadd [#allocation6], 4294967264 }
  0x2c   :  { %1868 = dma.done.wait [#allocation9], 1024  }
  0x2d   :  { %1869 = vsyncadd [#allocation9], 4294966272 }
  0x2e   :  { %1870 = dma.done.wait [#allocation12], 512  }
  0x2f   :  { %1871 = vsyncadd [#allocation12], 4294966784  ;;  %vm179_vm0 = vcmask 261120   ;;  %v2058_v0 = vld [vmem:[#allocation2] sm:$0xff]  ;;  %v1882_v2 = vmov 32.0   ;;  %s2484_s5 = sld [smem:[#allocation22_spill]] }
  0x30   :  { %v180_v1 = vsel %vm179_vm0, %v2058_v0, 0.0  ;;  %1626 = vrcp.f32 %v1882_v2  ;;  %s2485_s29 = sld [smem:[#allocation23_spill]]  ;;  %v2092_v31 = vld [vmem:[#allocation5] ss:$0 sm:$0xff]  ;;  %v2094_v34 = vld [vmem:[#allocation7] ss:$0 sm:$0xff] }
  0x31   :  { %181 = vadd.xlane.f32.xlu0 %v180_v1  ;;  %vm303_vm5 = vcmask 130048   ;;  %vm331_vm6 = vcmask 64512   ;;  %v2108_v43 = vld [vmem:[#allocation2 + $0x8] sm:$0xff]  ;;  %s1884_s28 = smov 112   ;;  %s1885_s0 = smov 80  }
  0x32   :  { %v183_v44 = vsel %vm179_vm0, %v2108_v43, 0.0  ;;  %s2486_s11 = sld [smem:[#allocation24_spill]]  ;;  %s1886_s30 = smov 16  }
  0x33   :  { %s2487_s21 = sld [smem:[#allocation25_spill]] }
  0x34   :  { %s2491_s1 = sld [smem:[#allocation29_spill]] }
  0x35   :  { %v246_v14 = vld [vmem:[%s2484_s5 + $0x18] sm:$0xff]  ;;  %v245_v16 = vld [vmem:[%s2484_s5 + $0x10] sm:$0xff]  ;;  %v244_v18 = vld [vmem:[%s2484_s5 + $0x8] sm:$0xff]  ;;  %s2492_s3 = sld [smem:[#allocation30_spill]] }
  0x36   :  { %v1627_v3 = vpop.eup %1626  ;;  %v279_v15 = vld [vmem:[%s2485_s29 + $0x18] sm:$0xff]  ;;  %265 = vmatpush.msra.mxu0 %v246_v14  ;;  %v278_v17 = vld [vmem:[%s2485_s29 + $0x10] sm:$0xff]  ;;  %v277_v19 = vld [vmem:[%s2485_s29 + $0x8] sm:$0xff] }
  0x37   :  { %v187_v4 = vmul.f32 32.0, %v1627_v3  ;;  %vm191_vm1 = vweird.f32 %v1627_v3  ;;  %292 = vmatpush.msra.mxu1 %v279_v15  ;;  %v243_v20 = vld [vmem:[%s2484_s5] sm:$0xff]  ;;  %s1883_s5 = smov 96  }
  0x38   :  { %266 = vmatpush.msra.mxu0 %v245_v16  ;;  %v276_v21 = vld [vmem:[%s2485_s29] sm:$0xff] }
  0x39   :  { %v188_v5 = vsub.f32 1.0, %v187_v4  ;;  %293 = vmatpush.msra.mxu1 %v278_v17 }
  0x3a   :  { %267 = vmatpush.msra.mxu0 %v244_v18 }
  0x3b   :  { %v189_v6 = vmul.f32 %v1627_v3, %v188_v5  ;;  %294 = vmatpush.msra.mxu1 %v277_v19 }
  0x3c   :  { %268 = vmatpush.msra.mxu0 %v243_v20 }
  0x3d   :  { %v190_v7 = vadd.f32 %v1627_v3, %v189_v6  ;;  %295 = vmatpush.msra.mxu1 %v276_v21 }
  0x3f   :  { %v2062_v8 = vsel %vm191_vm1, %v1627_v3, %v190_v7 }
  0xa4   :  { %v182_v9 = vpop.xlane.xlu0 %181 }
  0xa5   :  { %v193_v10 = vmul.f32 %v2062_v8, %v182_v9 }
  0xa7   :  { %v195_v11 = vsub.f32 %v2058_v0, %v193_v10 }
  0xa9   :  { %v197_v12 = vmul.f32 %v195_v11, %v195_v11 }
  0xab   :  { %v199_v13 = vsel %vm179_vm0, %v197_v12, 0.0 }
  0xac   :  { %200 = vadd.xlane.f32.xlu0 %v199_v13 }
 0x11f   :  { %v201_v22 = vpop.xlane.xlu0 %200 }
 0x120   :  { %v205_v23 = vmul.f32 %v201_v22, %v2062_v8 }
 0x122   :  { %v207_v24 = vadd.f32 1e-05, %v205_v23 }
 0x124   :  { %1628 = vrsqrt.f32 %v207_v24  ;;  %vm215_vm3 = vweird.f32 %v207_v24 }
 0x12a   :  { %v1629_v25 = vpop.eup %1628 }
 0x12b   :  { %v210_v26 = vmul.f32 %v1629_v25, %v207_v24  ;;  %vm216_vm2 = vweird.f32 %v1629_v25 }
 0x12c   :  { %vm217_vm4 = vmor %vm215_vm3, %vm216_vm2 }
 0x12d   :  { %v211_v27 = vmul.f32 %v1629_v25, %v210_v26 }
 0x12f   :  { %v212_v28 = vmul.f32 0.5, %v211_v27 }
 0x131   :  { %v213_v29 = vsub.f32 1.5, %v212_v28 }
 0x133   :  { %v214_v30 = vmul.f32 %v1629_v25, %v213_v29 }
 0x135   :  { %v218_v32 = vsel %vm217_vm4, %v1629_v25, %v214_v30 }
 0x136   :  { %v229_v33 = vmul.f32 %v218_v32, %v195_v11 }
 0x138   :  { %v235_v35 = vmul.f32 %v2092_v31, %v229_v33 }
 0x13a   :  { %v241_v36 = vadd.f32 %v2094_v34, %v235_v35 }
 0x13c   :  { %1552 = vmatmul.msk.f32.vlgmr.msra.gmra.mxu0 %vm179_vm0, %v241_v36  ;;  %1554 = vmatmul.msk.f32.vlgmr.msra.gmra.mxu1 %vm179_vm0, %v241_v36 }
 0x1b9   :  { %v2100_v37 = vpop.f32.mrf.mxu1  ;;  %v270_v38 = vpop.f32.mrf.mxu0 }
 0x1ba   :  { %343 = vrot.lane.b32.xlu0 %v2100_v37, %s1883_s5  ;;  %1556 = vmatpush.xpose.msk.msra.mxu2 %vm303_vm5, %v2100_v37 }
 0x1bd   :  { %1557 = vmatmul.msk.f32.vlgmr.msra.gmra.mxu2 %vm303_vm5, %v270_v38 }
 0x22c   :  { %v344_v39 = vpop.permute.xlu0 %343 }
 0x22d   :  { %364 = vmatpush.msra.mxu3 %v344_v39 }
 0x240   :  { %v327_v40 = vpop.f32.mrf.mxu2 }
 0x241   :  { %v330_v41 = vmul.f32 0.25, %v327_v40 }
 0x243   :  { %v332_v42 = vsel %vm331_vm6, %v330_v41, -inf }
 0x244   :  { %333 = vmax.xlane.f32.xlu1 %v332_v42 }
 0x24c   :  { %184 = vadd.xlane.f32.xlu1 %v183_v44 }
 0x265   :  { %371 = vrot.lane.b32.xlu1 %v2100_v37, %s1884_s28 }
 0x2b7   :  { %v334_v45 = vpop.xlane.xlu1 %333 }
 0x2b8   :  { %v335_v46 = vsub.f32 %v330_v41, %v334_v45  ;;  %v578_v45 = vld [vmem:[%s2486_s11 + $0x18] sm:$0xff] }
 0x2ba   :  { %v336_v49 = vmul.f32 1.442695, %v335_v46  ;;  %v577_v46 = vld [vmem:[%s2486_s11 + $0x10] sm:$0xff] }
 0x2bc   :  { %1630 = vpow2.f32 %v336_v49 }
 0x2bf   :  { %v185_v47 = vpop.xlane.xlu1 %184 }
 0x2c0   :  { %v194_v48 = vmul.f32 %v2062_v8, %v185_v47  ;;  %v576_v47 = vld [vmem:[%s2486_s11 + $0x8] sm:$0xff] }
 0x2c2   :  { %v196_v50 = vsub.f32 %v2108_v43, %v194_v48  ;;  %v1631_v53 = vpop.eup %1630 }
 0x2c3   :  { %v338_v54 = vsel %vm331_vm6, %v1631_v53, 0.0 }
 0x2c4   :  { %v198_v51 = vmul.f32 %v196_v50, %v196_v50 }
 0x2c6   :  { %v202_v52 = vsel %vm179_vm0, %v198_v51, 0.0 }
 0x2c7   :  { %203 = vadd.xlane.f32.xlu2 %v202_v52 }
 0x2cf   :  { %339 = vadd.xlane.f32.xlu2 %v338_v54 }
 0x2d7   :  { %v372_v55 = vpop.permute.xlu1 %371 }
 0x2d8   :  { %1559 = vmatpush.xpose.msk.msrb.mxu3 %vm303_vm5, %v372_v55 }
 0x2e7   :  { %369 = vrot.lane.b32.xlu2 %v270_v38, %s1884_s28 }
 0x33a   :  { %v204_v56 = vpop.xlane.xlu2 %203 }
 0x33b   :  { %v206_v57 = vmul.f32 %v204_v56, %v2062_v8 }
 0x33d   :  { %v208_v58 = vadd.f32 1e-05, %v206_v57 }
 0x33f   :  { %1632 = vrsqrt.f32 %v208_v58  ;;  %vm225_vm8 = vweird.f32 %v208_v58 }
 0x342   :  { %v340_v59 = vpop.xlane.xlu2 %339 }
 0x343   :  { %1634 = vrcp.f32 %v340_v59 }
 0x345   :  { %v1633_v60 = vpop.eup %1632 }
 0x346   :  { %v220_v61 = vmul.f32 %v1633_v60, %v208_v58  ;;  %vm226_vm7 = vweird.f32 %v1633_v60 }
 0x347   :  { %vm227_vm9 = vmor %vm225_vm8, %vm226_vm7  ;;  %vm799_vm8 = vcmask 523264  }
 0x348   :  { %v221_v62 = vmul.f32 %v1633_v60, %v220_v61 }
 0x349   :  { %v1635_v63 = vpop.eup %1634 }
 0x34a   :  { %v222_v1 = vmul.f32 0.5, %v221_v62  ;;  %v342_v2 = vmul.f32 %v1635_v63, %v1631_v53  ;;  %v370_v7 = vpop.permute.xlu2 %369  ;;  %v575_v53 = vld [vmem:[%s2486_s11] sm:$0xff]  ;;  %s2488_s11 = sld [smem:[#allocation28_spill]] }
 0x34c   :  { %v223_v3 = vsub.f32 1.5, %v222_v1  ;;  %1558 = vmatmul.msk.f32.vlgmr.msra.gmra.mxu3 %vm331_vm6, %v342_v2 }
 0x34e   :  { %v224_v4 = vmul.f32 %v1633_v60, %v223_v3 }
 0x350   :  { %v228_v5 = vsel %vm227_vm9, %v1633_v60, %v224_v4  ;;  %v1612_v60 = vld [vmem:[%s2487_s21] ss:$0 sm:$0xff]  ;;  %s2489_s21 = sld [smem:[#allocation26_spill]] }
 0x351   :  { %v230_v6 = vmul.f32 %v228_v5, %v196_v50 }
 0x353   :  { %v236_v9 = vmul.f32 %v2092_v31, %v230_v6 }
 0x354   :  { %1560 = vmatmul.msk.f32.vlgmr.msrb.gmra.mxu3 %vm303_vm5, %v370_v7 }
 0x355   :  { %v242_v10 = vadd.f32 %v2094_v34, %v236_v9 }
 0x357   :  { %1553 = vmatmul.msk.f32.gmra.mxu0 %vm179_vm0, %v242_v10  ;;  %1555 = vmatmul.msk.f32.gmra.mxu1 %vm179_vm0, %v242_v10 }
 0x3cf   :  { %v2127_v11 = vpop.f32.mrf.mxu3 }
 0x3d4   :  { %v273_v12 = vpop.f32.mrf.mxu0  ;;  %v300_v13 = vpop.f32.mrf.mxu1 }
 0x3d5   :  { %506 = vrot.lane.b32.xlu2 %v300_v13, %s1884_s28  ;;  %504 = vrot.lane.b32.xlu1 %v273_v12, %s1884_s28 }
 0x3d6   :  { %1562 = vmatpush.xpose.msk.msra.mxu3 %vm303_vm5, %v300_v13 }
 0x3d7   :  { %v394_v14 = vpop.f32.mrf.mxu3 }
 0x3d8   :  { %v397_v15 = vmul.f32 0.25, %v394_v14  ;;  %v670_v14 = vld [vmem:[%s2488_s11] sm:$0xff] }
 0x3d9   :  { %1563 = vmatmul.msk.f32.vlgmr.msra.gmra.mxu3 %vm303_vm5, %v273_v12  ;;  %v672_v12 = vld [vmem:[%s2488_s11 + $0x10] sm:$0xff] }
 0x3da   :  { %v398_v16 = vsel %vm331_vm6, %v397_v15, -inf  ;;  %601 = vmatpush.msrb.mxu3 %v578_v45 }
 0x3db   :  { %399 = vmax.xlane.f32.xlu0 %v398_v16 }
 0x3dc   :  { %602 = vmatpush.msrb.mxu3 %v577_v46 }
 0x3dd   :  { %409 = vrot.lane.b32.xlu1 %v2100_v37, %s1885_s0 }
 0x3de   :  { %603 = vmatpush.msrb.mxu3 %v576_v47 }
 0x3e0   :  { %604 = vmatpush.msrb.mxu3 %v575_v53 }
 0x42f   :  { %v507_v17 = vpop.permute.xlu2 %506 }
 0x430   :  { %1565 = vmatpush.xpose.msk.msrb.mxu0 %vm303_vm5, %v507_v17 }
 0x447   :  { %v505_v18 = vpop.permute.xlu1 %504 }
 0x448   :  { %1566 = vmatmul.msk.f32.vlgmr.msrb.gmra.mxu0 %vm303_vm5, %v505_v18 }
 0x44e   :  { %v400_v19 = vpop.xlane.xlu0 %399 }
 0x44f   :  { %v401_v20 = vsub.f32 %v397_v15, %v400_v19  ;;  %v410_v21 = vpop.permute.xlu1 %409 }
 0x450   :  { %430 = vmatpush.msrb.mxu2 %v410_v21 }
 0x451   :  { %v402_v22 = vmul.f32 1.442695, %v401_v20 }
 0x453   :  { %1636 = vpow2.f32 %v402_v22 }
 0x459   :  { %v1637_v23 = vpop.eup %1636 }
 0x45a   :  { %v404_v24 = vsel %vm331_vm6, %v1637_v23, 0.0 }
 0x45b   :  { %405 = vadd.xlane.f32.xlu2 %v404_v24 }
 0x45c   :  { %v463_v25 = vpop.f32.mrf.mxu3 }
 0x45d   :  { %v466_v26 = vmul.f32 0.25, %v463_v25 }
 0x45f   :  { %v467_v27 = vsel %vm331_vm6, %v466_v26, -inf }
 0x460   :  { %468 = vmax.xlane.f32.xlu0 %v467_v27 }
 0x4c5   :  { %v529_v28 = vpop.f32.mrf.mxu0 }
 0x4c6   :  { %v532_v29 = vmul.f32 0.25, %v529_v28  ;;  %v2199_v28 = vld [vmem:[%s2489_s21] ss:$0 sm:$0xff] }
 0x4c8   :  { %v533_v30 = vsel %vm331_vm6, %v532_v29, -inf }
 0x4c9   :  { %534 = vmax.xlane.f32.xlu1 %v533_v30 }
 0x4ce   :  { %v406_v31 = vpop.xlane.xlu2 %405 }
 0x4cf   :  { %1638 = vrcp.f32 %v406_v31 }
 0x4d3   :  { %v469_v32 = vpop.xlane.xlu0 %468 }
 0x4d4   :  { %v470_v33 = vsub.f32 %v466_v26, %v469_v32 }
 0x4d5   :  { %v1639_v34 = vpop.eup %1638 }
 0x4d6   :  { %v471_v35 = vmul.f32 1.442695, %v470_v33  ;;  %v408_v36 = vmul.f32 %v1639_v34, %v1637_v23 }
 0x4d8   :  { %1640 = vpow2.f32 %v471_v35  ;;  %1561 = vmatmul.msk.f32.vlgmr.msrb.gmra.mxu2 %vm331_vm6, %v408_v36 }
 0x4de   :  { %v1641_v37 = vpop.eup %1640 }
 0x4df   :  { %v473_v38 = vsel %vm331_vm6, %v1641_v37, 0.0 }
 0x4e0   :  { %474 = vadd.xlane.f32.xlu1 %v473_v38  ;;  %v2219_v38 = vld [vmem:[%s2491_s1] ss:$0 sm:$0xff] }
 0x4f9   :  { %478 = vrot.lane.b32.xlu1 %v300_v13, %s1883_s5 }
 0x53c   :  { %v535_v39 = vpop.xlane.xlu1 %534 }
 0x53d   :  { %v536_v40 = vsub.f32 %v532_v29, %v535_v39 }
 0x53f   :  { %v537_v41 = vmul.f32 1.442695, %v536_v40 }
 0x541   :  { %1642 = vpow2.f32 %v537_v41 }
 0x547   :  { %v1643_v42 = vpop.eup %1642 }
 0x548   :  { %v539_v44 = vsel %vm331_vm6, %v1643_v42, 0.0 }
 0x549   :  { %540 = vadd.xlane.f32.xlu0 %v539_v44 }
 0x553   :  { %v475_v49 = vpop.xlane.xlu1 %474 }
 0x554   :  { %1644 = vrcp.f32 %v475_v49 }
 0x55a   :  { %v1645_v50 = vpop.eup %1644 }
 0x55b   :  { %v432_v48 = vpop.f32.mrf.mxu2  ;;  %v477_v51 = vmul.f32 %v1645_v50, %v1641_v37 }
 0x55c   :  { %436 = vrot.lane.b32.xlu2 %v432_v48, %s1886_s30 }
 0x55d   :  { %544 = vrot.lane.b32.xlu0 %v300_v13, %s1885_s0  ;;  %v671_v13 = vld [vmem:[%s2488_s11 + $0x8] sm:$0xff] }
 0x56b   :  { %v479_v52 = vpop.permute.xlu1 %478 }
 0x56c   :  { %499 = vmatpush.msra.mxu2 %v479_v52 }
 0x56d   :  { %1564 = vmatmul.msk.f32.vlgmr.msra.gmra.mxu2 %vm331_vm6, %v477_v51 }
 0x5b6   :  { %v437_v54 = vpop.permute.xlu2 %436 }
 0x5b7   :  { %v439_v55 = vsel %vm303_vm5, %v2127_v11, %v437_v54  ;;  %v673_v11 = vld [vmem:[%s2488_s11 + $0x18] sm:$0xff]  ;;  %s2490_s11 = sld [smem:[#allocation27_spill]] }
 0x5b8   :  { %1568 = vmatmul.msk.f32.vlgmr.msrb.gmra.mxu3 %vm179_vm0, %v439_v55  ;;  %696 = vmatpush.msra.mxu0 %v673_v11  ;;  %v787_v11 = vld [vmem:[%s2492_s3] sm:$0xff] }
 0x5ba   :  { %697 = vmatpush.msra.mxu0 %v672_v12 }
 0x5bc   :  { %v541_v56 = vpop.xlane.xlu0 %540  ;;  %698 = vmatpush.msra.mxu0 %v671_v13 }
 0x5bd   :  { %1646 = vrcp.f32 %v541_v56  ;;  %v2204_v30 = vld [vmem:[%s2490_s11] ss:$0 sm:$0xff] }
 0x5be   :  { %699 = vmatpush.msra.mxu0 %v670_v14 }
 0x5c3   :  { %v1647_v57 = vpop.eup %1646 }
 0x5c4   :  { %v543_v59 = vmul.f32 %v1647_v57, %v1643_v42 }
 0x5cf   :  { %v545_v58 = vpop.permute.xlu0 %544 }
 0x5d0   :  { %565 = vmatpush.msrb.mxu1 %v545_v58 }
 0x5d1   :  { %1567 = vmatmul.msk.f32.vlgmr.msrb.gmra.mxu1 %vm331_vm6, %v543_v59  ;;  %v794_v59 = vld [vmem:[%s2492_s3 + $0x38] sm:$0xff] }
 0x5d2   :  { %814 = vmatpush.msrb.mxu0 %v794_v59 }
 0x5f0   :  { %v501_v3 = vpop.f32.mrf.mxu2 }
 0x63b   :  { %v606_v61 = vpop.f32.mrf.mxu3 }
 0x63c   :  { %v607_v62 = vadd.f32 %v1612_v60, %v606_v61 }
 0x63e   :  { %v2168_v63 = vadd.f32 %v607_v62, %v2058_v0  ;;  %v792_v62 = vld [vmem:[%s2492_s3 + $0x28] sm:$0xff] }
 0x640   :  { %v614_v1 = vsel %vm179_vm0, %v2168_v63, 0.0 }
 0x641   :  { %615 = vadd.xlane.f32.xlu0 %v614_v1  ;;  %v791_v1 = vld [vmem:[%s2492_s3 + $0x20] sm:$0xff] }
 0x64e   :  { %v567_v2 = vpop.f32.mrf.mxu1 }
 0x64f   :  { %571 = vrot.lane.b32.xlu2 %v567_v2, %s1886_s30 }
 0x6a9   :  { %v572_v4 = vpop.permute.xlu2 %571 }
 0x6aa   :  { %v574_v5 = vsel %vm303_vm5, %v501_v3, %v572_v4  ;;  %v790_v4 = vld [vmem:[%s2492_s3 + $0x18] sm:$0xff] }
 0x6ab   :  { %1569 = vmatmul.msk.f32.gmra.mxu3 %vm179_vm0, %v574_v5  ;;  %v789_v5 = vld [vmem:[%s2492_s3 + $0x10] sm:$0xff] }
 0x6b4   :  { %v616_v6 = vpop.xlane.xlu0 %615 }
 0x6b5   :  { %v620_v7 = vmul.f32 %v616_v6, %v2062_v8 }
 0x6b7   :  { %v622_v9 = vsub.f32 %v2168_v63, %v620_v7 }
 0x6b9   :  { %v624_v0 = vmul.f32 %v622_v9, %v622_v9 }
 0x6bb   :  { %v626_v10 = vsel %vm179_vm0, %v624_v0, 0.0 }
 0x6bc   :  { %627 = vadd.xlane.f32.xlu2 %v626_v10 }
 0x72e   :  { %v609_v15 = vpop.f32.mrf.mxu3 }
 0x72f   :  { %v610_v16 = vadd.f32 %v1612_v60, %v609_v15  ;;  %v628_v17 = vpop.xlane.xlu2 %627  ;;  %v793_v60 = vld [vmem:[%s2492_s3 + $0x30] sm:$0xff] }
 0x730   :  { %v632_v18 = vmul.f32 %v628_v17, %v2062_v8  ;;  %815 = vmatpush.msrb.mxu0 %v793_v60 }
 0x731   :  { %v2192_v19 = vadd.f32 %v610_v16, %v2108_v43 }
 0x732   :  { %v634_v20 = vadd.f32 1e-05, %v632_v18  ;;  %816 = vmatpush.msrb.mxu0 %v792_v62 }
 0x733   :  { %v617_v21 = vsel %vm179_vm0, %v2192_v19, 0.0 }
 0x734   :  { %1648 = vrsqrt.f32 %v634_v20  ;;  %618 = vadd.xlane.f32.xlu1 %v617_v21  ;;  %vm642_vm11 = vweird.f32 %v634_v20  ;;  %817 = vmatpush.msrb.mxu0 %v791_v1 }
 0x736   :  { %818 = vmatpush.msrb.mxu0 %v790_v4 }
 0x738   :  { %819 = vmatpush.msrb.mxu0 %v789_v5 }
 0x73a   :  { %v1649_v22 = vpop.eup %1648 }
 0x73b   :  { %v637_v23 = vmul.f32 %v1649_v22, %v634_v20  ;;  %vm643_vm10 = vweird.f32 %v1649_v22 }
 0x73c   :  { %vm644_vm12 = vmor %vm642_vm11, %vm643_vm10 }
 0x73d   :  { %v638_v24 = vmul.f32 %v1649_v22, %v637_v23 }
 0x73f   :  { %v639_v25 = vmul.f32 0.5, %v638_v24 }
 0x741   :  { %v640_v26 = vsub.f32 1.5, %v639_v25 }
 0x743   :  { %v641_v27 = vmul.f32 %v1649_v22, %v640_v26 }
 0x745   :  { %v645_v43 = vsel %vm644_vm12, %v1649_v22, %v641_v27 }
 0x746   :  { %v656_v29 = vmul.f32 %v645_v43, %v622_v9  ;;  %v788_v9 = vld [vmem:[%s2492_s3 + $0x8] sm:$0xff] }
 0x747   :  { %820 = vmatpush.msrb.mxu0 %v788_v9 }
 0x748   :  { %v662_v31 = vmul.f32 %v2199_v28, %v656_v29 }
 0x749   :  { %821 = vmatpush.msrb.mxu0 %v787_v11 }
 0x74a   :  { %v668_v32 = vadd.f32 %v2204_v30, %v662_v31 }
 0x74c   :  { %1570 = vmatmul.msk.f32.vlgmr.msra.gmra.mxu0 %vm179_vm0, %v668_v32 }
 0x7a7   :  { %v619_v33 = vpop.xlane.xlu1 %618 }
 0x7a8   :  { %v621_v34 = vmul.f32 %v619_v33, %v2062_v8 }
 0x7aa   :  { %v2211_v35 = vsub.f32 %v2192_v19, %v621_v34 }
 0x7ac   :  { %v625_v36 = vmul.f32 %v2211_v35, %v2211_v35 }
 0x7ae   :  { %v629_v37 = vsel %vm179_vm0, %v625_v36, 0.0 }
 0x7af   :  { %630 = vadd.xlane.f32.xlu0 %v629_v37 }
 0x7c9   :  { %v701_v39 = vpop.f32.mrf.mxu0 }
 0x7ca   :  { %v2222_v40 = vadd.f32 %v2219_v38, %v701_v39 }
 0x7cc   :  { %v2225_v41 = vmul.f32 0.70710677, %v2222_v40  ;;  %v707_v36 = vmul.f32 0.5, %v2222_v40 }
 0x7ce   :  { %v711_v42 = vand.u32 2147483647, %v2225_v41  ;;  %vm777_vm7 = vcmp.ge.f32.partialorder %v2225_v41, 0.0 }
 0x7d0   :  { %v713_v44 = vmul.f32 0.3275911, %v711_v42  ;;  %v765_v3 = vsub.f32 0.0, %v711_v42 }
 0x7d2   :  { %v715_v45 = vadd.f32 1.0, %v713_v44  ;;  %v767_v0 = vmul.f32 %v765_v3, %v711_v42 }
 0x7d4   :  { %1650 = vrcp.f32 %v715_v45  ;;  %v728_v51 = vand.u32 2147483648, %v715_v45  ;;  %vm722_vm14 = vweird.f32 %v715_v45  ;;  %v726_v52 = vand.u32 2147483647, %v715_v45 }
 0x7d5   :  { %v769_v14 = vmul.f32 1.442695, %v767_v0 }
 0x7d6   :  { %v729_v54 = vor.u32 1.1754944e-38, %v728_v51  ;;  %vm727_vm1 = vcmp.eq.f32.partialorder %v726_v52, 8.507059e+37 }
 0x7da   :  { %v1651_v46 = vpop.eup %1650 }
 0x7db   :  { %v718_v47 = vmul.f32 %v1651_v46, %v715_v45  ;;  %vm723_vm13 = vweird.f32 %v1651_v46 }
 0x7dc   :  { %vm724_vm15 = vmor %vm722_vm14, %vm723_vm13 }
 0x7dd   :  { %v719_v48 = vsub.f32 1.0, %v718_v47 }
 0x7df   :  { %v720_v49 = vmul.f32 %v1651_v46, %v719_v48 }
 0x7e1   :  { %v721_v50 = vadd.f32 %v1651_v46, %v720_v49 }
 0x7e3   :  { %v725_v53 = vsel %vm724_vm15, %v1651_v46, %v721_v50 }
 0x7e4   :  { %v730_v55 = vsel %vm727_vm1, %v729_v54, %v725_v53 }
 0x7e5   :  { %v747_v56 = vmul.f32 1.0614054, %v730_v55 }
 0x7e7   :  { %v749_v57 = vadd.f32 -1.4531521, %v747_v56 }
 0x7e9   :  { %v751_v58 = vmul.f32 %v749_v57, %v730_v55 }
 0x7eb   :  { %v753_v61 = vadd.f32 1.4214138, %v751_v58 }
 0x7ed   :  { %v755_v2 = vmul.f32 %v753_v61, %v730_v55 }
 0x7ef   :  { %v757_v6 = vadd.f32 -0.28449672, %v755_v2 }
 0x7f1   :  { %v759_v13 = vmul.f32 %v757_v6, %v730_v55 }
 0x7f3   :  { %v761_v15 = vadd.f32 0.2548296, %v759_v13 }
 0x7f5   :  { %v763_v17 = vmul.f32 %v761_v15, %v730_v55 }
 0x822   :  { %v631_v7 = vpop.xlane.xlu0 %630 }
 0x823   :  { %v633_v10 = vmul.f32 %v631_v7, %v2062_v8 }
 0x825   :  { %v635_v12 = vadd.f32 1e-05, %v633_v10 }
 0x827   :  { %1652 = vrsqrt.f32 %v635_v12  ;;  %vm652_vm3 = vweird.f32 %v635_v12 }
 0x828   :  { %1654 = vpow2.f32 %v769_v14 }
 0x82d   :  { %v1653_v16 = vpop.eup %1652 }
 0x82e   :  { %v647_v18 = vmul.f32 %v1653_v16, %v635_v12  ;;  %v1655_v21 = vpop.eup %1654  ;;  %vm653_vm2 = vweird.f32 %v1653_v16 }
 0x82f   :  { %v773_v22 = vmul.f32 %v1655_v21, %v763_v17  ;;  %vm654_vm4 = vmor %vm652_vm3, %vm653_vm2 }
 0x830   :  { %v648_v20 = vmul.f32 %v1653_v16, %v647_v18 }
 0x831   :  { %v775_v25 = vsub.f32 1.0, %v773_v22 }
 0x832   :  { %v649_v23 = vmul.f32 0.5, %v648_v20 }
 0x833   :  { %v779_v29 = vsub.f32 0.0, %v775_v25 }
 0x834   :  { %v650_v24 = vsub.f32 1.5, %v649_v23 }
 0x835   :  { %v781_v33 = vsel %vm777_vm7, %v775_v25, %v779_v29  ;;  %v923_v25 = vld [vmem:[#allocation8 + $0x18] sm:$0xff]  ;;  %v887_v29 = vld [vmem:[%s2451_s15] sm:$0xff] }
 0x836   :  { %v651_v26 = vmul.f32 %v1653_v16, %v650_v24  ;;  %v783_v34 = vadd.f32 1.0, %v781_v33  ;;  %v890_v24 = vld [vmem:[%s2451_s15 + $0x18] sm:$0xff]  ;;  %936 = vmatpush.msra.mxu3 %v923_v25 }
 0x837   :  { %909 = vmatpush.msra.mxu1 %v890_v24 }
 0x838   :  { %v655_v27 = vsel %vm654_vm4, %v1653_v16, %v651_v26  ;;  %v785_v37 = vmul.f32 %v783_v34, %v707_v36  ;;  %v889_v26 = vld [vmem:[%s2451_s15 + $0x10] sm:$0xff] }
 0x839   :  { %v657_v43 = vmul.f32 %v655_v27, %v2211_v35  ;;  %v922_v27 = vld [vmem:[#allocation8 + $0x10] sm:$0xff]  ;;  %910 = vmatpush.msra.mxu1 %v889_v26 }
 0x83a   :  { %937 = vmatpush.msra.mxu3 %v922_v27 }
 0x83b   :  { %v663_v31 = vmul.f32 %v2199_v28, %v657_v43  ;;  %v1616_v28 = vld [vmem:[%s2448_s12] ss:$0 sm:$0xff] }
 0x83c   :  { %v921_v43 = vld [vmem:[#allocation8 + $0x8] sm:$0xff] }
 0x83d   :  { %v669_v32 = vadd.f32 %v2204_v30, %v663_v31  ;;  %938 = vmatpush.msra.mxu3 %v921_v43  ;;  %v920_v31 = vld [vmem:[#allocation8] sm:$0xff] }
 0x83f   :  { %1571 = vmatmul.msk.f32.gmra.mxu0 %vm179_vm0, %v669_v32  ;;  %939 = vmatpush.msra.mxu3 %v920_v31 }
 0x847   :  { %1572 = vmatmul.msk.f32.vlgmr.msrb.gmra.mxu0 %vm799_vm8, %v785_v37 }
 0x8bc   :  { %v704_v39 = vpop.f32.mrf.mxu0 }
 0x8bd   :  { %v705_v35 = vadd.f32 %v2219_v38, %v704_v39 }
 0x8bf   :  { %v710_v42 = vmul.f32 0.70710677, %v705_v35  ;;  %v708_v11 = vmul.f32 0.5, %v705_v35 }
 0x8c1   :  { %v712_v44 = vand.u32 2147483647, %v710_v42  ;;  %vm778_vm13 = vcmp.ge.f32.partialorder %v710_v42, 0.0 }
 0x8c3   :  { %v714_v30 = vmul.f32 0.3275911, %v712_v44  ;;  %v766_v56 = vsub.f32 0.0, %v712_v44 }
 0x8c4   :  { %v823_v41 = vpop.f32.mrf.mxu0 }
 0x8c5   :  { %v716_v45 = vadd.f32 1.0, %v714_v30  ;;  %v824_v46 = vadd.f32 %v1616_v28, %v823_v41  ;;  %v768_v59 = vmul.f32 %v766_v56, %v712_v44 }
 0x8c7   :  { %1656 = vrcp.f32 %v716_v45  ;;  %v2265_v40 = vadd.f32 %v824_v46, %v2168_v63  ;;  %v743_v50 = vand.u32 2147483648, %v716_v45  ;;  %v741_v52 = vand.u32 2147483647, %v716_v45 }
 0x8c8   :  { %vm737_vm10 = vweird.f32 %v716_v45  ;;  %v771_v62 = vmul.f32 1.442695, %v768_v59 }
 0x8c9   :  { %v831_v47 = vsel %vm179_vm0, %v2265_v40, 0.0  ;;  %v744_v54 = vor.u32 1.1754944e-38, %v743_v50  ;;  %vm742_vm12 = vcmp.eq.f32.partialorder %v741_v52, 8.507059e+37 }
 0x8ca   :  { %832 = vadd.xlane.f32.xlu2 %v831_v47  ;;  %1658 = vpow2.f32 %v771_v62 }
 0x8cd   :  { %v1657_v48 = vpop.eup %1656 }
 0x8ce   :  { %v733_v38 = vmul.f32 %v1657_v48, %v716_v45  ;;  %vm738_vm9 = vweird.f32 %v1657_v48  ;;  %v1618_v45 = vld [vmem:[%s2450_s14] ss:$0 sm:$0xff] }
 0x8cf   :  { %vm739_vm11 = vmor %vm737_vm10, %vm738_vm9 }
 0x8d0   :  { %v734_v49 = vsub.f32 1.0, %v733_v38  ;;  %v1659_v6 = vpop.eup %1658 }
 0x8d2   :  { %v735_v51 = vmul.f32 %v1657_v48, %v734_v49 }
 0x8d4   :  { %v736_v53 = vadd.f32 %v1657_v48, %v735_v51 }
 0x8d6   :  { %v740_v55 = vsel %vm739_vm11, %v1657_v48, %v736_v53 }
 0x8d7   :  { %v745_v63 = vsel %vm742_vm12, %v744_v54, %v740_v55 }
 0x8d8   :  { %v748_v57 = vmul.f32 1.0614054, %v745_v63 }
 0x8da   :  { %v750_v58 = vadd.f32 -1.4531521, %v748_v57 }
 0x8dc   :  { %v752_v60 = vmul.f32 %v750_v58, %v745_v63 }
 0x8de   :  { %v754_v61 = vadd.f32 1.4214138, %v752_v60 }
 0x8e0   :  { %v756_v1 = vmul.f32 %v754_v61, %v745_v63 }
 0x8e2   :  { %v758_v2 = vadd.f32 -0.28449672, %v756_v1 }
 0x8e4   :  { %v760_v3 = vmul.f32 %v758_v2, %v745_v63 }
 0x8e6   :  { %v762_v4 = vadd.f32 0.2548296, %v760_v3 }
 0x8e8   :  { %v764_v5 = vmul.f32 %v762_v4, %v745_v63 }
 0x8ea   :  { %v774_v7 = vmul.f32 %v1659_v6, %v764_v5 }
 0x8ec   :  { %v776_v9 = vsub.f32 1.0, %v774_v7 }
 0x8ee   :  { %v780_v0 = vsub.f32 0.0, %v776_v9 }
 0x8f0   :  { %v782_v10 = vsel %vm778_vm13, %v776_v9, %v780_v0 }
 0x8f1   :  { %v784_v12 = vadd.f32 1.0, %v782_v10 }
 0x8f3   :  { %v786_v13 = vmul.f32 %v784_v12, %v708_v11 }
 0x8f5   :  { %1573 = vmatmul.msk.f32.gmra.mxu0 %vm799_vm8, %v786_v13 }
 0x93d   :  { %v833_v14 = vpop.xlane.xlu2 %832 }
 0x93e   :  { %v837_v15 = vmul.f32 %v833_v14, %v2062_v8 }
 0x940   :  { %v839_v16 = vsub.f32 %v2265_v40, %v837_v15 }
 0x942   :  { %v841_v17 = vmul.f32 %v839_v16, %v839_v16 }
 0x944   :  { %v843_v18 = vsel %vm179_vm0, %v841_v17, 0.0 }
 0x945   :  { %844 = vadd.xlane.f32.xlu0 %v843_v18 }
 0x972   :  { %v826_v20 = vpop.f32.mrf.mxu0 }
 0x973   :  { %v827_v21 = vadd.f32 %v1616_v28, %v826_v20  ;;  %v1617_v28 = vld [vmem:[%s2449_s13] ss:$0 sm:$0xff] }
 0x975   :  { %v2274_v22 = vadd.f32 %v827_v21, %v2192_v19  ;;  %v888_v19 = vld [vmem:[%s2451_s15 + $0x8] sm:$0xff] }
 0x976   :  { %911 = vmatpush.msra.mxu1 %v888_v19 }
 0x977   :  { %v834_v23 = vsel %vm179_vm0, %v2274_v22, 0.0 }
 0x978   :  { %835 = vadd.xlane.f32.xlu2 %v834_v23  ;;  %912 = vmatpush.msra.mxu1 %v887_v29 }
 0x9b8   :  { %v845_v32 = vpop.xlane.xlu0 %844 }
 0x9b9   :  { %v849_v33 = vmul.f32 %v845_v32, %v2062_v8 }
 0x9bb   :  { %v851_v34 = vadd.f32 1e-05, %v849_v33 }
 0x9bd   :  { %1660 = vrsqrt.f32 %v851_v34  ;;  %vm859_vm15 = vweird.f32 %v851_v34 }
 0x9c3   :  { %v1661_v36 = vpop.eup %1660 }
 0x9c4   :  { %v854_v37 = vmul.f32 %v1661_v36, %v851_v34  ;;  %vm860_vm14 = vweird.f32 %v1661_v36 }
 0x9c5   :  { %vm861_vm1 = vmor %vm859_vm15, %vm860_vm14 }
 0x9c6   :  { %v855_v39 = vmul.f32 %v1661_v36, %v854_v37 }
 0x9c8   :  { %v856_v35 = vmul.f32 0.5, %v855_v39 }
 0x9ca   :  { %v857_v42 = vsub.f32 1.5, %v856_v35 }
 0x9cc   :  { %v858_v44 = vmul.f32 %v1661_v36, %v857_v42 }
 0x9ce   :  { %v862_v30 = vsel %vm861_vm1, %v1661_v36, %v858_v44 }
 0x9cf   :  { %v873_v41 = vmul.f32 %v862_v30, %v839_v16 }
 0x9d1   :  { %v879_v46 = vmul.f32 %v1617_v28, %v873_v41 }
 0x9d3   :  { %v885_v47 = vadd.f32 %v1618_v45, %v879_v46 }
 0x9d5   :  { %1574 = vmatmul.msk.f32.vlgmr.msra.gmra.mxu1 %vm179_vm0, %v885_v47  ;;  %1576 = vmatmul.msk.f32.vlgmr.msra.gmra.mxu3 %vm179_vm0, %v885_v47 }
 0x9eb   :  { %v836_v48 = vpop.xlane.xlu2 %835 }
 0x9ec   :  { %v838_v38 = vmul.f32 %v836_v48, %v2062_v8 }
 0x9ee   :  { %v840_v49 = vsub.f32 %v2274_v22, %v838_v38 }
 0x9f0   :  { %v842_v50 = vmul.f32 %v840_v49, %v840_v49 }
 0x9f2   :  { %v846_v51 = vsel %vm179_vm0, %v842_v50, 0.0 }
 0x9f3   :  { %847 = vadd.xlane.f32.xlu0 %v846_v51 }
 0xa52   :  { %v914_v52 = vpop.f32.mrf.mxu1 }
 0xa53   :  { %1011 = vrot.lane.b32.xlu0 %v914_v52, %s1884_s28 }
 0xa58   :  { %v2303_v53 = vpop.f32.mrf.mxu3 }
 0xa59   :  { %1578 = vmatpush.xpose.msk.msrb.mxu2 %vm303_vm5, %v2303_v53  ;;  %1013 = vrot.lane.b32.xlu2 %v2303_v53, %s1884_s28 }
 0xa5c   :  { %1579 = vmatmul.msk.f32.vlgmr.msrb.gmra.mxu2 %vm303_vm5, %v914_v52 }
 0xa66   :  { %v848_v54 = vpop.xlane.xlu0 %847 }
 0xa67   :  { %v850_v55 = vmul.f32 %v848_v54, %v2062_v8 }
 0xa69   :  { %v852_v56 = vadd.f32 1e-05, %v850_v55 }
 0xa6b   :  { %1662 = vrsqrt.f32 %v852_v56  ;;  %vm869_vm3 = vweird.f32 %v852_v56 }
 0xa71   :  { %v1663_v63 = vpop.eup %1662 }
 0xa72   :  { %v864_v57 = vmul.f32 %v1663_v63, %v852_v56  ;;  %vm870_vm2 = vweird.f32 %v1663_v63 }
 0xa73   :  { %vm871_vm4 = vmor %vm869_vm3, %vm870_vm2 }
 0xa74   :  { %v865_v58 = vmul.f32 %v1663_v63, %v864_v57  ;;  %v1220_v57 = vld [vmem:[#allocation10 + $0x18] sm:$0xff] }
 0xa76   :  { %v866_v59 = vmul.f32 0.5, %v865_v58 }
 0xa78   :  { %v867_v60 = vsub.f32 1.5, %v866_v59  ;;  %v1219_v59 = vld [vmem:[#allocation10 + $0x10] sm:$0xff] }
 0xa7a   :  { %v868_v61 = vmul.f32 %v1663_v63, %v867_v60  ;;  %v1218_v60 = vld [vmem:[#allocation10 + $0x8] sm:$0xff] }
 0xa7c   :  { %v872_v62 = vsel %vm871_vm4, %v1663_v63, %v868_v61  ;;  %v1217_v61 = vld [vmem:[#allocation10] sm:$0xff] }
 0xa7d   :  { %v874_v1 = vmul.f32 %v872_v62, %v840_v49 }
 0xa7f   :  { %v880_v2 = vmul.f32 %v1617_v28, %v874_v1 }
 0xa81   :  { %v886_v3 = vadd.f32 %v1618_v45, %v880_v2 }
 0xa83   :  { %1575 = vmatmul.msk.f32.gmra.mxu1 %vm179_vm0, %v886_v3  ;;  %1577 = vmatmul.msk.f32.gmra.mxu3 %vm179_vm0, %v886_v3 }
 0xab3   :  { %v1014_v4 = vpop.permute.xlu2 %1013 }
 0xab4   :  { %1581 = vmatpush.xpose.msk.msra.mxu2 %vm303_vm5, %v1014_v4 }
 0xac5   :  { %v1012_v5 = vpop.permute.xlu0 %1011 }
 0xac6   :  { %1582 = vmatmul.msk.f32.vlgmr.msra.gmra.mxu2 %vm303_vm5, %v1012_v5 }
 0xadf   :  { %v970_v6 = vpop.f32.mrf.mxu2 }
 0xae0   :  { %v973_v7 = vmul.f32 0.25, %v970_v6 }
 0xae2   :  { %v974_v9 = vsel %vm331_vm6, %v973_v7, -inf }
 0xae3   :  { %975 = vmax.xlane.f32.xlu1 %v974_v9 }
 0xb00   :  { %v917_v0 = vpop.f32.mrf.mxu1 }
 0xb01   :  { %1146 = vrot.lane.b32.xlu0 %v917_v0, %s1884_s28 }
 0xb06   :  { %v2317_v10 = vpop.f32.mrf.mxu3 }
 0xb07   :  { %1148 = vrot.lane.b32.xlu1 %v2317_v10, %s1884_s28 }
 0xb0f   :  { %985 = vrot.lane.b32.xlu1 %v2303_v53, %s1883_s5 }
 0xb49   :  { %v1036_v11 = vpop.f32.mrf.mxu2 }
 0xb4a   :  { %v1039_v12 = vmul.f32 0.25, %v1036_v11 }
 0xb4c   :  { %v1040_v13 = vsel %vm331_vm6, %v1039_v12, -inf }
 0xb4d   :  { %1041 = vmax.xlane.f32.xlu0 %v1040_v13 }
 0xb56   :  { %v976_v14 = vpop.xlane.xlu1 %975 }
 0xb57   :  { %v977_v15 = vsub.f32 %v973_v7, %v976_v14 }
 0xb59   :  { %v978_v16 = vmul.f32 1.442695, %v977_v15 }
 0xb5b   :  { %1664 = vpow2.f32 %v978_v16 }
 0xb61   :  { %v1665_v17 = vpop.eup %1664 }
 0xb62   :  { %v980_v18 = vsel %vm331_vm6, %v1665_v17, 0.0 }
 0xb63   :  { %981 = vadd.xlane.f32.xlu2 %v980_v18 }
 0xb73   :  { %v1147_v21 = vpop.permute.xlu0 %1146 }
 0xb79   :  { %v1149_v20 = vpop.permute.xlu1 %1148 }
 0xb7a   :  { %1587 = vmatpush.xpose.msk.msrb.mxu2 %vm303_vm5, %v1149_v20 }
 0xb7d   :  { %1588 = vmatmul.msk.f32.vlgmr.msrb.gmra.mxu2 %vm303_vm5, %v1147_v21 }
 0xb81   :  { %v986_v23 = vpop.permute.xlu1 %985 }
 0xb82   :  { %1006 = vmatpush.msrb.mxu1 %v986_v23 }
 0xb84   :  { %1584 = vmatpush.xpose.msk.msra.mxu1 %vm303_vm5, %v2317_v10 }
 0xbc0   :  { %v1042_v24 = vpop.xlane.xlu0 %1041 }
 0xbc1   :  { %v1043_v25 = vsub.f32 %v1039_v12, %v1042_v24 }
 0xbc3   :  { %v1044_v26 = vmul.f32 1.442695, %v1043_v25 }
 0xbc5   :  { %1666 = vpow2.f32 %v1044_v26  ;;  %v1315_v26 = vld [vmem:[#allocation11 + $0x18] sm:$0xff] }
 0xbcb   :  { %v1667_v27 = vpop.eup %1666 }
 0xbcc   :  { %v1046_v19 = vsel %vm331_vm6, %v1667_v27, 0.0 }
 0xbcd   :  { %1047 = vadd.xlane.f32.xlu0 %v1046_v19  ;;  %v1313_v19 = vld [vmem:[#allocation11 + $0x8] sm:$0xff] }
 0xbd6   :  { %v982_v43 = vpop.xlane.xlu2 %981 }
 0xbd7   :  { %1668 = vrcp.f32 %v982_v43 }
 0xbdd   :  { %v1669_v29 = vpop.eup %1668 }
 0xbde   :  { %v984_v31 = vmul.f32 %v1669_v29, %v1665_v17  ;;  %v1312_v29 = vld [vmem:[#allocation11] sm:$0xff] }
 0xbe0   :  { %1580 = vmatmul.msk.f32.vlgmr.msrb.gmra.mxu1 %vm331_vm6, %v984_v31 }
 0xbe1   :  { %1186 = vrot.lane.b32.xlu0 %v2317_v10, %s1885_s0  ;;  %1243 = vmatpush.msrb.mxu1 %v1220_v57 }
 0xbe3   :  { %1244 = vmatpush.msrb.mxu1 %v1219_v59  ;;  %v1622_v59 = vld [vmem:[%s2458_s22] ss:$0 sm:$0xff] }
 0xbe5   :  { %1245 = vmatpush.msrb.mxu1 %v1218_v60 }
 0xbe7   :  { %1246 = vmatpush.msrb.mxu1 %v1217_v61 }
 0xbe8   :  { %1585 = vmatmul.msk.f32.vlgmr.msra.gmra.mxu1 %vm303_vm5, %v917_v0  ;;  %v1619_v0 = vld [vmem:[%s2454_s18] ss:$0 sm:$0xff] }
 0xc00   :  { %v1171_v32 = vpop.f32.mrf.mxu2 }
 0xc01   :  { %v1174_v33 = vmul.f32 0.25, %v1171_v32 }
 0xc03   :  { %v1175_v34 = vsel %vm331_vm6, %v1174_v33, -inf }
 0xc04   :  { %1176 = vmax.xlane.f32.xlu1 %v1175_v34 }
 0xc1d   :  { %1051 = vrot.lane.b32.xlu1 %v2303_v53, %s1885_s0 }
 0xc40   :  { %v1048_v41 = vpop.xlane.xlu0 %1047 }
 0xc53   :  { %v1187_v38 = vpop.permute.xlu0 %1186 }
 0xc5d   :  { %v1008_v36 = vpop.f32.mrf.mxu1 }
 0xc65   :  { %v1105_v37 = vpop.f32.mrf.mxu1 }
 0xc66   :  { %v1108_v39 = vmul.f32 0.25, %v1105_v37 }
 0xc68   :  { %v1109_v35 = vsel %vm331_vm6, %v1108_v39, -inf }
 0xc69   :  { %1110 = vmax.xlane.f32.xlu2 %v1109_v35 }
 0xc77   :  { %v1177_v42 = vpop.xlane.xlu1 %1176 }
 0xc78   :  { %v1178_v44 = vsub.f32 %v1174_v33, %v1177_v42 }
 0xc7a   :  { %v1179_v28 = vmul.f32 1.442695, %v1178_v44 }
 0xc7c   :  { %1670 = vpow2.f32 %v1179_v28  ;;  %v1620_v28 = vld [vmem:[%s2455_s19] ss:$0 sm:$0xff]  ;;  %s1536_s19 = sshll.u32 %s2463_s27, 4  ;;  %s1537_s19 = int_to_ptr.hbm [resolvable:$true] %s1536_s19 }
 0xc7d   :  { %1672 = vrcp.f32 %v1048_v41 }
 0xc82   :  { %v1671_v30 = vpop.eup %1670 }
 0xc83   :  { %v1181_v45 = vsel %vm331_vm6, %v1671_v30, 0.0  ;;  %v1673_v46 = vpop.eup %1672 }
 0xc84   :  { %1182 = vadd.xlane.f32.xlu2 %v1181_v45  ;;  %v1050_v47 = vmul.f32 %v1673_v46, %v1667_v27  ;;  %v1314_v27 = vld [vmem:[#allocation11 + $0x10] sm:$0xff]  ;;  %v1621_v45 = vld [vmem:[%s2456_s20] ss:$0 sm:$0xff] }
 0xc8f   :  { %v1052_v48 = vpop.permute.xlu1 %1051 }
 0xc90   :  { %1072 = vmatpush.msra.mxu0 %v1052_v48 }
 0xc91   :  { %1583 = vmatmul.msk.f32.vlgmr.msra.gmra.mxu0 %vm331_vm6, %v1050_v47 }
 0xc92   :  { %1207 = vmatpush.msrb.mxu0 %v1187_v38 }
 0xcdc   :  { %v1111_v49 = vpop.xlane.xlu2 %1110 }
 0xcdd   :  { %v1112_v50 = vsub.f32 %v1108_v39, %v1111_v49 }
 0xcdf   :  { %v1113_v51 = vmul.f32 1.442695, %v1112_v50 }
 0xce1   :  { %1674 = vpow2.f32 %v1113_v51 }
 0xce7   :  { %v1675_v52 = vpop.eup %1674 }
 0xce8   :  { %v1115_v53 = vsel %vm331_vm6, %v1675_v52, 0.0 }
 0xce9   :  { %1116 = vadd.xlane.f32.xlu2 %v1115_v53 }
 0xcf7   :  { %v1183_v54 = vpop.xlane.xlu2 %1182 }
 0xcf8   :  { %1676 = vrcp.f32 %v1183_v54 }
 0xcfe   :  { %v1677_v55 = vpop.eup %1676 }
 0xcff   :  { %v1185_v56 = vmul.f32 %v1677_v55, %v1671_v30 }
 0xd01   :  { %1589 = vmatmul.msk.f32.vlgmr.msrb.gmra.mxu0 %vm331_vm6, %v1185_v56  ;;  %1120 = vrot.lane.b32.xlu2 %v2317_v10, %s1883_s5 }
 0xd0e   :  { %v1074_v63 = vpop.f32.mrf.mxu0 }
 0xd0f   :  { %1078 = vrot.lane.b32.xlu0 %v1074_v63, %s1886_s30 }
 0xd5c   :  { %v1117_v58 = vpop.xlane.xlu2 %1116 }
 0xd5d   :  { %1678 = vrcp.f32 %v1117_v58 }
 0xd63   :  { %v1679_v62 = vpop.eup %1678 }
 0xd64   :  { %v1119_v1 = vmul.f32 %v1679_v62, %v1675_v52  ;;  %v1121_v2 = vpop.permute.xlu2 %1120 }
 0xd65   :  { %1141 = vmatpush.msrb.mxu3 %v1121_v2 }
 0xd66   :  { %1586 = vmatmul.msk.f32.vlgmr.msrb.gmra.mxu3 %vm331_vm6, %v1119_v1 }
 0xd67   :  { %1338 = vmatpush.msra.mxu3 %v1315_v26 }
 0xd69   :  { %1339 = vmatpush.msra.mxu3 %v1314_v27 }
 0xd6b   :  { %1340 = vmatpush.msra.mxu3 %v1313_v19 }
 0xd6d   :  { %1341 = vmatpush.msra.mxu3 %v1312_v29 }
 0xd7e   :  { %v1209_v3 = vpop.f32.mrf.mxu0 }
 0xd7f   :  { %1213 = vrot.lane.b32.xlu1 %v1209_v3, %s1886_s30 }
 0xd81   :  { %v1079_v4 = vpop.permute.xlu0 %1078 }
 0xd82   :  { %v1081_v5 = vsel %vm303_vm5, %v1008_v36, %v1079_v4  ;;  %v1436_v4 = vld [vmem:[%s2459_s23 + $0x38] sm:$0xff] }
 0xd83   :  { %1590 = vmatmul.msk.f32.vlgmr.msrb.gmra.mxu1 %vm179_vm0, %v1081_v5  ;;  %1455 = vmatpush.msra.mxu2 %v1436_v4  ;;  %v1435_v5 = vld [vmem:[%s2459_s23 + $0x30] sm:$0xff] }
 0xd85   :  { %1456 = vmatpush.msra.mxu2 %v1435_v5 }
 0xde9   :  { %v1143_v6 = vpop.f32.mrf.mxu3 }
 0xdf1   :  { %v1214_v7 = vpop.permute.xlu1 %1213 }
 0xdf2   :  { %v1216_v9 = vsel %vm303_vm5, %v1143_v6, %v1214_v7  ;;  %v1434_v6 = vld [vmem:[%s2459_s23 + $0x28] sm:$0xff]  ;;  %v1433_v7 = vld [vmem:[%s2459_s23 + $0x20] sm:$0xff] }
 0xdf3   :  { %1591 = vmatmul.msk.f32.gmra.mxu1 %vm179_vm0, %v1216_v9  ;;  %1457 = vmatpush.msra.mxu2 %v1434_v6 }
 0xdf5   :  { %1458 = vmatpush.msra.mxu2 %v1433_v7 }
 0xe00   :  { %v1248_v10 = vpop.f32.mrf.mxu1 }
 0xe01   :  { %v1249_v11 = vadd.f32 %v1619_v0, %v1248_v10  ;;  %v1432_v10 = vld [vmem:[%s2459_s23 + $0x18] sm:$0xff] }
 0xe02   :  { %1459 = vmatpush.msra.mxu2 %v1432_v10 }
 0xe03   :  { %v2355_v12 = vadd.f32 %v1249_v11, %v2265_v40 }
 0xe05   :  { %v1256_v13 = vsel %vm179_vm0, %v2355_v12, 0.0 }
 0xe06   :  { %1257 = vadd.xlane.f32.xlu0 %v1256_v13  ;;  %v1431_v13 = vld [vmem:[%s2459_s23 + $0x10] sm:$0xff] }
 0xe07   :  { %1460 = vmatpush.msra.mxu2 %v1431_v13 }
 0xe70   :  { %v1251_v14 = vpop.f32.mrf.mxu1 }
 0xe71   :  { %v1252_v15 = vadd.f32 %v1619_v0, %v1251_v14 }
 0xe73   :  { %v2360_v16 = vadd.f32 %v1252_v15, %v2274_v22 }
 0xe75   :  { %v1259_v17 = vsel %vm179_vm0, %v2360_v16, 0.0 }
 0xe76   :  { %1260 = vadd.xlane.f32.xlu1 %v1259_v17 }
 0xe79   :  { %v1258_v18 = vpop.xlane.xlu0 %1257 }
 0xe7a   :  { %v1262_v20 = vmul.f32 %v1258_v18, %v2062_v8  ;;  %v1430_v18 = vld [vmem:[%s2459_s23 + $0x8] sm:$0xff] }
 0xe7b   :  { %1461 = vmatpush.msra.mxu2 %v1430_v18 }
 0xe7c   :  { %v1264_v21 = vsub.f32 %v2355_v12, %v1262_v20  ;;  %v1429_v20 = vld [vmem:[%s2459_s23] sm:$0xff] }
 0xe7d   :  { %1462 = vmatpush.msra.mxu2 %v1429_v20  ;;  %v1623_v20 = vld [vmem:[%s2460_s24] ss:$0 sm:$0xff] }
 0xe7e   :  { %v1266_v40 = vmul.f32 %v1264_v21, %v1264_v21 }
 0xe80   :  { %v1268_v23 = vsel %vm179_vm0, %v1266_v40, 0.0 }
 0xe81   :  { %1269 = vadd.xlane.f32.xlu2 %v1268_v23 }
 0xee9   :  { %v1261_v24 = vpop.xlane.xlu1 %1260 }
 0xeea   :  { %v1263_v25 = vmul.f32 %v1261_v24, %v2062_v8 }
 0xeec   :  { %v1265_v22 = vsub.f32 %v2360_v16, %v1263_v25 }
 0xeee   :  { %v1267_v43 = vmul.f32 %v1265_v22, %v1265_v22 }
 0xef0   :  { %v1271_v31 = vsel %vm179_vm0, %v1267_v43, 0.0 }
 0xef1   :  { %1272 = vadd.xlane.f32.xlu0 %v1271_v31 }
 0xef4   :  { %v1270_v32 = vpop.xlane.xlu2 %1269 }
 0xef5   :  { %v1274_v33 = vmul.f32 %v1270_v32, %v2062_v8 }
 0xef7   :  { %v1276_v34 = vadd.f32 1e-05, %v1274_v33 }
 0xef9   :  { %1680 = vrsqrt.f32 %v1276_v34  ;;  %vm1284_vm6 = vweird.f32 %v1276_v34 }
 0xeff   :  { %v1681_v36 = vpop.eup %1680 }
 0xf00   :  { %v1279_v37 = vmul.f32 %v1681_v36, %v1276_v34  ;;  %vm1285_vm5 = vweird.f32 %v1681_v36 }
 0xf01   :  { %vm1286_vm7 = vmor %vm1284_vm6, %vm1285_vm5 }
 0xf02   :  { %v1280_v39 = vmul.f32 %v1681_v36, %v1279_v37 }
 0xf04   :  { %v1281_v35 = vmul.f32 0.5, %v1280_v39 }
 0xf06   :  { %v1282_v42 = vsub.f32 1.5, %v1281_v35 }
 0xf08   :  { %v1283_v44 = vmul.f32 %v1681_v36, %v1282_v42 }
 0xf0a   :  { %v1287_v30 = vsel %vm1286_vm7, %v1681_v36, %v1283_v44 }
 0xf0b   :  { %v1298_v41 = vmul.f32 %v1287_v30, %v1264_v21 }
 0xf0d   :  { %v1304_v46 = vmul.f32 %v1620_v28, %v1298_v41 }
 0xf0f   :  { %v1310_v47 = vadd.f32 %v1621_v45, %v1304_v46 }
 0xf11   :  { %1592 = vmatmul.msk.f32.vlgmr.msra.gmra.mxu3 %vm179_vm0, %v1310_v47 }
 0xf64   :  { %v1273_v48 = vpop.xlane.xlu0 %1272 }
 0xf65   :  { %v1275_v38 = vmul.f32 %v1273_v48, %v2062_v8 }
 0xf67   :  { %v1277_v49 = vadd.f32 1e-05, %v1275_v38 }
 0xf69   :  { %1682 = vrsqrt.f32 %v1277_v49  ;;  %vm1294_vm10 = vweird.f32 %v1277_v49 }
 0xf6f   :  { %v1683_v50 = vpop.eup %1682 }
 0xf70   :  { %v1289_v51 = vmul.f32 %v1683_v50, %v1277_v49  ;;  %vm1295_vm9 = vweird.f32 %v1683_v50 }
 0xf71   :  { %vm1296_vm11 = vmor %vm1294_vm10, %vm1295_vm9 }
 0xf72   :  { %v1290_v52 = vmul.f32 %v1683_v50, %v1289_v51 }
 0xf74   :  { %v1291_v53 = vmul.f32 0.5, %v1290_v52 }
 0xf76   :  { %v1292_v54 = vsub.f32 1.5, %v1291_v53 }
 0xf78   :  { %v1293_v55 = vmul.f32 %v1683_v50, %v1292_v54 }
 0xf7a   :  { %v1297_v56 = vsel %vm1296_vm11, %v1683_v50, %v1293_v55 }
 0xf7b   :  { %v1299_v63 = vmul.f32 %v1297_v56, %v1265_v22 }
 0xf7d   :  { %v1305_v57 = vmul.f32 %v1620_v28, %v1299_v63 }
 0xf7f   :  { %v1311_v58 = vadd.f32 %v1621_v45, %v1305_v57 }
 0xf81   :  { %1593 = vmatmul.msk.f32.gmra.mxu3 %vm179_vm0, %v1311_v58 }
 0xf94   :  { %v1343_v60 = vpop.f32.mrf.mxu3 }
 0xf95   :  { %v1344_v61 = vadd.f32 %v1622_v59, %v1343_v60 }
 0xf97   :  { %v1351_v62 = vmul.f32 0.70710677, %v1344_v61  ;;  %v1349_v28 = vmul.f32 0.5, %v1344_v61 }
 0xf99   :  { %v1353_v1 = vand.u32 2147483647, %v1351_v62  ;;  %vm1419_vm1 = vcmp.ge.f32.partialorder %v1351_v62, 0.0 }
 0xf9b   :  { %v1355_v2 = vmul.f32 0.3275911, %v1353_v1  ;;  %v1407_v25 = vsub.f32 0.0, %v1353_v1 }
 0xf9d   :  { %v1357_v3 = vadd.f32 1.0, %v1355_v2  ;;  %v1409_v27 = vmul.f32 %v1407_v25, %v1353_v1 }
 0xf9f   :  { %1684 = vrcp.f32 %v1357_v3  ;;  %v1370_v14 = vand.u32 2147483648, %v1357_v3  ;;  %v1368_v17 = vand.u32 2147483647, %v1357_v3  ;;  %vm1364_vm13 = vweird.f32 %v1357_v3 }
 0xfa0   :  { %v1411_v29 = vmul.f32 1.442695, %v1409_v27 }
 0xfa1   :  { %v1371_v40 = vor.u32 1.1754944e-38, %v1370_v14  ;;  %vm1369_vm15 = vcmp.eq.f32.partialorder %v1368_v17, 8.507059e+37 }
 0xfa2   :  { %1686 = vpow2.f32 %v1411_v29 }
 0xfa5   :  { %v1685_v9 = vpop.eup %1684 }
 0xfa6   :  { %v1360_v0 = vmul.f32 %v1685_v9, %v1357_v3  ;;  %vm1365_vm12 = vweird.f32 %v1685_v9 }
 0xfa7   :  { %vm1366_vm14 = vmor %vm1364_vm13, %vm1365_vm12 }
 0xfa8   :  { %v1361_v11 = vsub.f32 1.0, %v1360_v0  ;;  %v1687_v37 = vpop.eup %1686 }
 0xfaa   :  { %v1362_v15 = vmul.f32 %v1685_v9, %v1361_v11 }
 0xfac   :  { %v1363_v21 = vadd.f32 %v1685_v9, %v1362_v15 }
 0xfae   :  { %v1367_v23 = vsel %vm1366_vm14, %v1685_v9, %v1363_v21 }
 0xfaf   :  { %v1372_v24 = vsel %vm1369_vm15, %v1371_v40, %v1367_v23 }
 0xfb0   :  { %v1389_v26 = vmul.f32 1.0614054, %v1372_v24 }
 0xfb2   :  { %v1391_v22 = vadd.f32 -1.4531521, %v1389_v26 }
 0xfb4   :  { %v1393_v19 = vmul.f32 %v1391_v22, %v1372_v24 }
 0xfb6   :  { %v1395_v43 = vadd.f32 1.4214138, %v1393_v19 }
 0xfb8   :  { %v1397_v31 = vmul.f32 %v1395_v43, %v1372_v24 }
 0xfba   :  { %v1399_v32 = vadd.f32 -0.28449672, %v1397_v31 }
 0xfbc   :  { %v1401_v33 = vmul.f32 %v1399_v32, %v1372_v24 }
 0xfbe   :  { %v1403_v34 = vadd.f32 0.2548296, %v1401_v33 }
 0xfc0   :  { %v1405_v36 = vmul.f32 %v1403_v34, %v1372_v24 }
 0xfc2   :  { %v1415_v39 = vmul.f32 %v1687_v37, %v1405_v36 }
 0xfc4   :  { %v1417_v35 = vsub.f32 1.0, %v1415_v39 }
 0xfc6   :  { %v1421_v42 = vsub.f32 0.0, %v1417_v35 }
 0xfc8   :  { %v1423_v44 = vsel %vm1419_vm1, %v1417_v35, %v1421_v42 }
 0xfc9   :  { %v1425_v30 = vadd.f32 1.0, %v1423_v44 }
 0xfcb   :  { %v1427_v41 = vmul.f32 %v1425_v30, %v1349_v28 }
 0xfcd   :  { %1594 = vmatmul.msk.f32.vlgmr.msra.gmra.mxu2 %vm799_vm8, %v1427_v41 }
0x1004   :  { %v1346_v45 = vpop.f32.mrf.mxu3 }
0x1005   :  { %v1347_v46 = vadd.f32 %v1622_v59, %v1346_v45 }
0x1007   :  { %v1352_v47 = vmul.f32 0.70710677, %v1347_v46  ;;  %v1350_v15 = vmul.f32 0.5, %v1347_v46  ;;  %v1624_v46 = vld [vmem:[%s2461_s25] ss:$0 sm:$0xff]  ;;  %s1887_s25 = smov [#allocation13]  }
0x1009   :  { %v1354_v48 = vand.u32 2147483647, %v1352_v47  ;;  %vm1420_vm6 = vcmp.ge.f32.partialorder %v1352_v47, 0.0 }
0x100b   :  { %v1356_v38 = vmul.f32 0.3275911, %v1354_v48  ;;  %v1408_v58 = vsub.f32 0.0, %v1354_v48 }
0x100d   :  { %v1358_v49 = vadd.f32 1.0, %v1356_v38  ;;  %v1410_v62 = vmul.f32 %v1408_v58, %v1354_v48  ;;  %v1625_v38 = vld [vmem:[%s2462_s26] ss:$0 sm:$0xff]  ;;  %s1534_s26 = sshll.u32 %s1887_s25, 4  ;;  %s1535_s26 = int_to_ptr.vmem [resolvable:$true] %s1534_s26 }
0x100f   :  { %1688 = vrcp.f32 %v1358_v49  ;;  %v1385_v53 = vand.u32 2147483648, %v1358_v49  ;;  %v1383_v55 = vand.u32 2147483647, %v1358_v49  ;;  %vm1379_vm3 = vweird.f32 %v1358_v49 }
0x1010   :  { %v1413_v3 = vmul.f32 1.442695, %v1410_v62 }
0x1011   :  { %v1386_v63 = vor.u32 1.1754944e-38, %v1385_v53  ;;  %vm1384_vm5 = vcmp.eq.f32.partialorder %v1383_v55, 8.507059e+37 }
0x1012   :  { %1690 = vpow2.f32 %v1413_v3 }
0x1015   :  { %v1689_v50 = vpop.eup %1688 }
0x1016   :  { %v1375_v51 = vmul.f32 %v1689_v50, %v1358_v49  ;;  %vm1380_vm2 = vweird.f32 %v1689_v50 }
0x1017   :  { %vm1381_vm4 = vmor %vm1379_vm3, %vm1380_vm2 }
0x1018   :  { %v1376_v52 = vsub.f32 1.0, %v1375_v51  ;;  %v1691_v0 = vpop.eup %1690 }
0x101a   :  { %v1377_v54 = vmul.f32 %v1689_v50, %v1376_v52 }
0x101c   :  { %v1378_v56 = vadd.f32 %v1689_v50, %v1377_v54 }
0x101e   :  { %v1382_v57 = vsel %vm1381_vm4, %v1689_v50, %v1378_v56 }
0x101f   :  { %v1387_v59 = vsel %vm1384_vm5, %v1386_v63, %v1382_v57 }
0x1020   :  { %v1390_v60 = vmul.f32 1.0614054, %v1387_v59 }
0x1022   :  { %v1392_v61 = vadd.f32 -1.4531521, %v1390_v60 }
0x1024   :  { %v1394_v1 = vmul.f32 %v1392_v61, %v1387_v59 }
0x1026   :  { %v1396_v2 = vadd.f32 1.4214138, %v1394_v1 }
0x1028   :  { %v1398_v4 = vmul.f32 %v1396_v2, %v1387_v59 }
0x102a   :  { %v1400_v5 = vadd.f32 -0.28449672, %v1398_v4 }
0x102c   :  { %v1402_v6 = vmul.f32 %v1400_v5, %v1387_v59 }
0x102e   :  { %v1404_v7 = vadd.f32 0.2548296, %v1402_v6 }
0x1030   :  { %v1406_v9 = vmul.f32 %v1404_v7, %v1387_v59 }
0x1032   :  { %v1416_v10 = vmul.f32 %v1691_v0, %v1406_v9 }
0x1034   :  { %v1418_v11 = vsub.f32 1.0, %v1416_v10 }
0x1036   :  { %v1422_v13 = vsub.f32 0.0, %v1418_v11 }
0x1038   :  { %v1424_v14 = vsel %vm1420_vm6, %v1418_v11, %v1422_v13 }
0x1039   :  { %v1426_v17 = vadd.f32 1.0, %v1424_v14 }
0x103b   :  { %v1428_v18 = vmul.f32 %v1426_v17, %v1350_v15 }
0x103d   :  { %1595 = vmatmul.msk.f32.gmra.mxu2 %vm799_vm8, %v1428_v18 }
0x1050   :  { %v1464_v21 = vpop.f32.mrf.mxu2 }
0x1051   :  { %v1465_v40 = vadd.f32 %v1623_v20, %v1464_v21 }
0x1053   :  { %v1470_v23 = vadd.f32 %v1465_v40, %v2355_v12 }
0x1055   :  { %v1472_v24 = vsel %vm179_vm0, %v1470_v23, 0.0 }
0x1056   :  { %1473 = vadd.xlane.f32.xlu1 %v1472_v24 }
0x10c0   :  { %v1467_v25 = vpop.f32.mrf.mxu2 }
0x10c1   :  { %v1468_v26 = vadd.f32 %v1623_v20, %v1467_v25 }
0x10c3   :  { %v1471_v22 = vadd.f32 %v1468_v26, %v2360_v16 }
0x10c5   :  { %v1475_v27 = vsel %vm179_vm0, %v1471_v22, 0.0 }
0x10c6   :  { %1476 = vadd.xlane.f32.xlu2 %v1475_v27 }
0x10c9   :  { %v1474_v19 = vpop.xlane.xlu1 %1473 }
0x10ca   :  { %v1478_v43 = vmul.f32 %v1474_v19, %v2062_v8 }
0x10cc   :  { %v1480_v29 = vsub.f32 %v1470_v23, %v1478_v43 }
0x10ce   :  { %v1482_v31 = vmul.f32 %v1480_v29, %v1480_v29 }
0x10d0   :  { %v1484_v32 = vsel %vm179_vm0, %v1482_v31, 0.0 }
0x10d1   :  { %1485 = vadd.xlane.f32.xlu0 %v1484_v32 }
0x1139   :  { %v1477_v33 = vpop.xlane.xlu2 %1476 }
0x113a   :  { %v1479_v12 = vmul.f32 %v1477_v33, %v2062_v8 }
0x113c   :  { %v1481_v34 = vsub.f32 %v1471_v22, %v1479_v12 }
0x113e   :  { %v1483_v36 = vmul.f32 %v1481_v34, %v1481_v34 }
0x1140   :  { %v1487_v37 = vsel %vm179_vm0, %v1483_v36, 0.0 }
0x1141   :  { %1488 = vadd.xlane.f32.xlu1 %v1487_v37 }
0x1144   :  { %v1486_v16 = vpop.xlane.xlu0 %1485 }
0x1145   :  { %v1490_v39 = vmul.f32 %v1486_v16, %v2062_v8 }
0x1147   :  { %v1492_v35 = vadd.f32 1e-05, %v1490_v39 }
0x1149   :  { %1692 = vrsqrt.f32 %v1492_v35  ;;  %vm1500_vm7 = vweird.f32 %v1492_v35 }
0x114f   :  { %v1693_v42 = vpop.eup %1692 }
0x1150   :  { %v1495_v44 = vmul.f32 %v1693_v42, %v1492_v35  ;;  %vm1501_vm8 = vweird.f32 %v1693_v42 }
0x1151   :  { %vm1502_vm9 = vmor %vm1500_vm7, %vm1501_vm8 }
0x1152   :  { %v1496_v28 = vmul.f32 %v1693_v42, %v1495_v44 }
0x1154   :  { %v1497_v30 = vmul.f32 0.5, %v1496_v28 }
0x1156   :  { %v1498_v41 = vsub.f32 1.5, %v1497_v30 }
0x1158   :  { %v1499_v45 = vmul.f32 %v1693_v42, %v1498_v41 }
0x115a   :  { %v1503_v47 = vsel %vm1502_vm9, %v1693_v42, %v1499_v45 }
0x115b   :  { %v1514_v48 = vmul.f32 %v1503_v47, %v1480_v29 }
0x115d   :  { %v1520_v49 = vmul.f32 %v1624_v46, %v1514_v48 }
0x115f   :  { %v1526_v50 = vadd.f32 %v1625_v38, %v1520_v49 }
0x1161   :  { %1528 = vst.msk [vmem:[#allocation13] sm:$0xff] %vm179_vm0, %v1526_v50 }
0x11b4   :  { %v1489_v51 = vpop.xlane.xlu1 %1488 }
0x11b5   :  { %v1491_v52 = vmul.f32 %v1489_v51, %v2062_v8 }
0x11b7   :  { %v1493_v53 = vadd.f32 1e-05, %v1491_v52 }
0x11b9   :  { %1694 = vrsqrt.f32 %v1493_v53  ;;  %vm1510_vm11 = vweird.f32 %v1493_v53 }
0x11bf   :  { %v1695_v54 = vpop.eup %1694 }
0x11c0   :  { %v1505_v55 = vmul.f32 %v1695_v54, %v1493_v53  ;;  %vm1511_vm10 = vweird.f32 %v1695_v54 }
0x11c1   :  { %vm1512_vm12 = vmor %vm1510_vm11, %vm1511_vm10 }
0x11c2   :  { %v1506_v56 = vmul.f32 %v1695_v54, %v1505_v55 }
0x11c4   :  { %v1507_v63 = vmul.f32 0.5, %v1506_v56 }
0x11c6   :  { %v1508_v57 = vsub.f32 1.5, %v1507_v63 }
0x11c8   :  { %v1509_v58 = vmul.f32 %v1695_v54, %v1508_v57 }
0x11ca   :  { %v1513_v59 = vsel %vm1512_vm12, %v1695_v54, %v1509_v58 }
0x11cb   :  { %v1515_v60 = vmul.f32 %v1513_v59, %v1481_v34 }
0x11cd   :  { %v1521_v8 = vmul.f32 %v1624_v46, %v1515_v60 }
0x11cf   :  { %v1527_v61 = vadd.f32 %v1625_v38, %v1521_v8 }
0x11d1   :  { %1529 = vst.msk [vmem:[#allocation13 + $0x8] sm:$0xff] %vm179_vm0, %v1527_v61 }
0x11d2   :  { %1542 = dma.vmem_to_hbm [thread:$0]  %s1535_s26, 256, %s1537_s19, [#allocation4], %s1876_s7, %s1876_s7, %s1877_s4  }
0x11d3   :  { %1872 = dma.done.wait [#allocation4], 256  }
0x11d4   :  { %1873 = vsyncadd [#allocation4], 4294967040 }
0x11d5   :  { %1547 = vsyncpa [#allocation3], 1 }
0x11d6   :  { %1548 = vsyncpa [#allocation6], 1 }
0x11d7   :  { %1549 = vsyncpa [#allocation9], 1 }
0x11d8   :  { %1550 = vsyncpa [#allocation12], 1 }
0x11d9   :  { %1551 = vsyncpa [#allocation4], 1 }

</bundles_post_ra>
